<compile_context>
chip_gen: v6e
topology: v6e:2x2x1
jax: 0.10.0
libtpu: 0.0.40
codegen_flags: <defaults>
</compile_context>

<pallas_src>
import functools
import math

import jax
import jax.numpy as jnp
from jax.experimental import pallas as pl
from jax.experimental.pallas import tpu as pltpu


# ----------------------------------------------------------------------------
# Fused whole-stack kernel: grid = (batch, layer); layer axis is sequential.
# ----------------------------------------------------------------------------
def localformer_stack_kernel(
    x_ref, mask_ref,
    w3_ref, cb_ref,
    wqkv_ref, bqkv_ref, wo_ref, bo_ref,
    g1_ref, be1_ref,
    w1_ref, b1_ref, w2_ref, b2_ref,
    g2_ref, be2_ref,
    out_ref,
    act_sc,
    *, nheads, scale, eps):
    f32 = jnp.float32
    bf16 = jnp.bfloat16

    l = pl.program_id(1)
    num_layers = pl.num_programs(1)
    S, D = act_sc.shape
    dh = D // nheads

    # Load src into the resident activation scratch at the first layer only.
    @pl.when(l == 0)
    def _():
        act_sc[...] = x_ref[0]

    x = act_sc[...]                                        # (S, D) f32

    # ---- Conv1d(D, D, kernel=3, stride=1, pad=1) over seq: three accumulating
    # (S,D)x(D,D) matmuls (one per tap); boundary rows handled in-kernel.
    zrow = jnp.zeros((1, D), f32)
    x_prev = jnp.concatenate([zrow, x[:S - 1, :]], axis=0)  # row t holds x[t-1]
    x_next = jnp.concatenate([x[1:, :], zrow], axis=0)      # row t holds x[t+1]
    w3 = w3_ref[0]                                          # (3D, D) bf16
    conv = (jnp.dot(x_prev.astype(bf16), w3[0:D, :], preferred_element_type=f32)
            + jnp.dot(x.astype(bf16), w3[D:2 * D, :], preferred_element_type=f32)
            + jnp.dot(x_next.astype(bf16), w3[2 * D:3 * D, :],
                      preferred_element_type=f32)
            + cb_ref[0])

    # ---- residual into the transformer layer --------------------------------
    z = x + conv                                            # (S, D) f32
    z_bf = z.astype(bf16)

    # ---- MHA: fused QKV matmul, per-head softmax, head-concat folded into the
    # out-projection as accumulation over row blocks of Wo.
    qkv = jnp.dot(z_bf, wqkv_ref[0], preferred_element_type=f32) + bqkv_ref[0]
    q = qkv[:, 0:D] * scale                                 # scale q once
    k = qkv[:, D:2 * D]
    v = qkv[:, 2 * D:3 * D]
    mask = mask_ref[...]                                    # (S, S) additive f32
    wo = wo_ref[0]                                          # (D, D) bf16

    attn = jnp.zeros((S, D), f32)
    for h in range(nheads):                                 # static unroll
        sl = slice(h * dh, (h + 1) * dh)
        s = jax.lax.dot_general(q[:, sl].astype(bf16), k[:, sl].astype(bf16),
                                (((1,), (1,)), ((), ())),
                                preferred_element_type=f32)  # (S, S)
        s = s + mask
        s = s - jnp.max(s, axis=-1, keepdims=True)
        p = jnp.exp(s)
        denom = jnp.maximum(jnp.sum(p, axis=-1, keepdims=True), 1e-30)
        p = p * pl.reciprocal(denom, approx=True)
        o_h = jnp.dot(p.astype(bf16), v[:, sl].astype(bf16),
                      preferred_element_type=f32)            # (S, dh)
        attn = attn + jnp.dot(o_h.astype(bf16), wo[sl, :],
                              preferred_element_type=f32)    # (S, D) accumulate
    attn = attn + bo_ref[0]

    # ---- add & LayerNorm 1 (post-norm, biased variance, f32) -----------------
    z1 = z + attn
    mu = jnp.mean(z1, axis=-1, keepdims=True)
    zc = z1 - mu
    var = jnp.mean(zc * zc, axis=-1, keepdims=True)
    z1 = zc * jax.lax.rsqrt(var + eps) * g1_ref[0] + be1_ref[0]

    # ---- FFN: linear2(relu(linear1(x))) --------------------------------------
    hdn = jnp.dot(z1.astype(bf16), w1_ref[0], preferred_element_type=f32) + b1_ref[0]
    hdn = jnp.maximum(hdn, 0.0)
    ff = jnp.dot(hdn.astype(bf16), w2_ref[0], preferred_element_type=f32) + b2_ref[0]

    # ---- add & LayerNorm 2 ----------------------------------------------------
    z2 = z1 + ff
    mu2 = jnp.mean(z2, axis=-1, keepdims=True)
    zc2 = z2 - mu2
    var2 = jnp.mean(zc2 * zc2, axis=-1, keepdims=True)
    z2 = zc2 * jax.lax.rsqrt(var2 + eps) * g2_ref[0] + be2_ref[0]

    # Carry the activation to the next layer (stays in VMEM, never hits HBM).
    act_sc[...] = z2

    # Final epilogue: module returns output + out, where `out` is the LAST
    # layer's conv output -> fuse the add and write HBM exactly once.
    @pl.when(l == num_layers - 1)
    def _():
        out_ref[0] = z2 + conv


# ----------------------------------------------------------------------------
# Wrapper: one pallas_call for the whole stack; weights stacked over layers.
# ----------------------------------------------------------------------------
def localformer_encoder(src, mask, params, nhead, eps=1e-5):
    """src: (B, S, D) float32, mask: (S, S) additive float mask."""
    B, S, D = src.shape
    L = len(params)
    assert D % nhead == 0
    dff = params[0]["w1t"].shape[1]
    dh = D // nhead

    stack = lambda key: jnp.stack([p[key] for p in params], axis=0)
    # Fused QKV weight/bias: (L, D, 3D) / (L, 1, 3D).
    wqkv = jnp.stack(
        [jnp.concatenate([p["wq"], p["wk"], p["wv"]], axis=1) for p in params], axis=0)
    bqkv = jnp.stack(
        [jnp.concatenate([p["bq"], p["bk"], p["bv"]], axis=1) for p in params], axis=0)

    kern = functools.partial(localformer_stack_kernel, nheads=nhead,
                             scale=1.0 / math.sqrt(dh), eps=eps)

    act_spec = pl.BlockSpec((1, S, D), lambda b, l: (b, 0, 0))
    layer_spec = lambda shape: pl.BlockSpec((1,) + shape, lambda b, l: (l, 0, 0))

    out = pl.pallas_call(
        kern,
        out_shape=jax.ShapeDtypeStruct((B, S, D), jnp.float32),
        grid=(B, L),
        in_specs=[
            act_spec,                                  # src (read at layer 0)
            pl.BlockSpec((S, S), lambda b, l: (0, 0)),  # additive attention mask
            layer_spec((3 * D, D)),                    # conv weight (taps stacked)
            layer_spec((1, D)),                        # conv bias
            layer_spec((D, 3 * D)),                    # fused Wqkv
            layer_spec((1, 3 * D)),                    # fused bqkv
            layer_spec((D, D)), layer_spec((1, D)),    # Wo, bo
            layer_spec((1, D)), layer_spec((1, D)),    # ln1 gamma, beta
            layer_spec((D, dff)), layer_spec((1, dff)),  # W1, b1
            layer_spec((dff, D)), layer_spec((1, D)),    # W2, b2
            layer_spec((1, D)), layer_spec((1, D)),      # ln2 gamma, beta
        ],
        out_specs=act_spec,
        scratch_shapes=[pltpu.VMEM((S, D), jnp.float32)],   # resident activation
        compiler_params=pltpu.CompilerParams(
            dimension_semantics=("parallel", "arbitrary"),
            vmem_limit_bytes=48 * 1024 * 1024),
    )(src, mask,
      stack("conv_w"), stack("conv_b"),
      wqkv, bqkv, stack("wo"), stack("bo"),
      stack("ln1_g"), stack("ln1_b"),
      stack("w1t"), stack("b1"), stack("w2t"), stack("b2"),
      stack("ln2_g"), stack("ln2_b"))
    return out


# ----------------------------------------------------------------------------
# Parameter init (deterministic, synthetic — shapes from the module __init__)
# ----------------------------------------------------------------------------
def init_params(key, num_layers, d_model, nhead, dff):
    bf16 = jnp.bfloat16
    params = []
    for _ in range(num_layers):
        keys = jax.random.split(key, 12)
        key = keys[0]
        p = {}
        # Conv1d(d_model, d_model, 3, 1, 1): torch weight (D_out, D_in, 3).
        # Stack taps along the contraction dim: (3*D_in, D_out), tap k=0 first.
        conv_w = 0.05 * jax.random.normal(keys[1], (d_model, d_model, 3), jnp.float32)
        p["conv_w"] = jnp.transpose(conv_w, (2, 1, 0)).reshape(
            3 * d_model, d_model).astype(bf16)
        p["conv_b"] = 0.01 * jax.random.normal(keys[2], (1, d_model), jnp.float32)
        # MHA: in_proj_weight (3D, D), in_proj_bias (3D,); pre-transposed for x @ W.
        in_proj_w = 0.05 * jax.random.normal(keys[3], (3 * d_model, d_model), jnp.float32)
        in_proj_b = 0.01 * jax.random.normal(keys[4], (3 * d_model,), jnp.float32)
        wq, wk, wv = jnp.split(in_proj_w, 3, axis=0)
        bq, bk, bv = jnp.split(in_proj_b, 3, axis=0)
        p["wq"], p["wk"], p["wv"] = (wq.T.astype(bf16), wk.T.astype(bf16),
                                     wv.T.astype(bf16))
        p["bq"], p["bk"], p["bv"] = (bq.reshape(1, d_model), bk.reshape(1, d_model),
                                     bv.reshape(1, d_model))
        # out_proj: torch weight (D, D), bias (D,)
        wo = 0.05 * jax.random.normal(keys[5], (d_model, d_model), jnp.float32)
        p["wo"] = wo.T.astype(bf16)
        p["bo"] = 0.01 * jax.random.normal(keys[6], (1, d_model), jnp.float32)
        # FFN: linear1 (dff, D), linear2 (D, dff) -> transposed for x @ W
        w1 = 0.05 * jax.random.normal(keys[7], (dff, d_model), jnp.float32)
        w2 = 0.05 * jax.random.normal(keys[8], (d_model, dff), jnp.float32)
        p["w1t"], p["w2t"] = w1.T.astype(bf16), w2.T.astype(bf16)
        p["b1"] = 0.01 * jax.random.normal(keys[9], (1, dff), jnp.float32)
        p["b2"] = 0.01 * jax.random.normal(keys[10], (1, d_model), jnp.float32)
        # LayerNorms
        p["ln1_g"] = jnp.ones((1, d_model), jnp.float32)
        p["ln1_b"] = jnp.zeros((1, d_model), jnp.float32)
        p["ln2_g"] = jnp.ones((1, d_model), jnp.float32)
        p["ln2_b"] = jnp.zeros((1, d_model), jnp.float32)
        params.append(p)
    return params


# ----------------------------------------------------------------------------
# Pure-JAX f32 reference (same math, no Pallas) for a correctness check
# ----------------------------------------------------------------------------
def reference_forward(src, mask, params, nheads, eps=1e-5):
    f32 = jnp.float32

    def ln(u, g, b):
        mu = jnp.mean(u, -1, keepdims=True)
        var = jnp.mean((u - mu) ** 2, -1, keepdims=True)
        return (u - mu) * jax.lax.rsqrt(var + eps) * g + b

    def layer(x, p):
        B, S, D = x.shape
        dh = D // nheads
        xp = jnp.pad(x, ((0, 0), (1, 1), (0, 0)))
        x_cat = jnp.concatenate([xp[:, 0:S], xp[:, 1:S + 1], xp[:, 2:S + 2]], axis=-1)
        conv = x_cat @ p["conv_w"].astype(f32) + p["conv_b"]
        z = x + conv
        q = z @ p["wq"].astype(f32) + p["bq"]
        k = z @ p["wk"].astype(f32) + p["bk"]
        v = z @ p["wv"].astype(f32) + p["bv"]
        qh = q.reshape(B, S, nheads, dh).transpose(0, 2, 1, 3)
        kh = k.reshape(B, S, nheads, dh).transpose(0, 2, 1, 3)
        vh = v.reshape(B, S, nheads, dh).transpose(0, 2, 1, 3)
        s = jnp.einsum("bhqd,bhkd->bhqk", qh, kh) / math.sqrt(dh) + mask
        a = jax.nn.softmax(s, axis=-1)
        attn = jnp.einsum("bhqk,bhkd->bhqd", a, vh)
        attn = attn.transpose(0, 2, 1, 3).reshape(B, S, D)
        attn = attn @ p["wo"].astype(f32) + p["bo"]
        z1 = ln(z + attn, p["ln1_g"], p["ln1_b"])
        hdn = jnp.maximum(z1 @ p["w1t"].astype(f32) + p["b1"], 0.0)
        ff = hdn @ p["w2t"].astype(f32) + p["b2"]
        z2 = ln(z1 + ff, p["ln2_g"], p["ln2_b"])
        return z2, conv

    output, out = src, src
    for p in params:
        output, out = layer(output, p)
    return output + out


# ----------------------------------------------------------------------------
if __name__ == "__main__":
    B, S, D = 2, 8, 32
    NHEAD, DFF, NUM_LAYERS = 4, 64, 2

    key = jax.random.PRNGKey(0)
    k_src, k_par = jax.random.split(key)
    src = jax.random.normal(k_src, (B, S, D), jnp.float32)   # (batch, seq, d_model)
    mask = jnp.zeros((S, S), jnp.float32)                    # additive attention mask

    params = init_params(k_par, NUM_LAYERS, D, NHEAD, DFF)

    fwd = jax.jit(functools.partial(localformer_encoder, nhead=NHEAD))
    result = fwd(src, mask, params)
    jax.block_until_ready(result)

    assert result.shape == (B, S, D)
    assert bool(jnp.all(jnp.isfinite(result)))

    ref = reference_forward(src, mask, params, NHEAD)
    max_err = float(jnp.max(jnp.abs(result - ref)))
    assert max_err < 5e-2, f"mismatch vs pure-JAX reference: max abs err {max_err}"

    print("KERNEL_OK")
</pallas_src>

<mosaic_0001>
module attributes {stable_mosaic.version = 11 : i64} {
  func.func @localformer_stack_kernel(%arg0: i32, %arg1: i32, %arg2: memref<1x8x32xf32, #tpu.memory_space<vmem>>, %arg3: memref<8x8xf32, #tpu.memory_space<vmem>>, %arg4: memref<1x96x32xbf16, #tpu.memory_space<vmem>>, %arg5: memref<1x1x32xf32, #tpu.memory_space<vmem>>, %arg6: memref<1x32x96xbf16, #tpu.memory_space<vmem>>, %arg7: memref<1x1x96xf32, #tpu.memory_space<vmem>>, %arg8: memref<1x32x32xbf16, #tpu.memory_space<vmem>>, %arg9: memref<1x1x32xf32, #tpu.memory_space<vmem>>, %arg10: memref<1x1x32xf32, #tpu.memory_space<vmem>>, %arg11: memref<1x1x32xf32, #tpu.memory_space<vmem>>, %arg12: memref<1x32x64xbf16, #tpu.memory_space<vmem>>, %arg13: memref<1x1x64xf32, #tpu.memory_space<vmem>>, %arg14: memref<1x64x32xbf16, #tpu.memory_space<vmem>>, %arg15: memref<1x1x32xf32, #tpu.memory_space<vmem>>, %arg16: memref<1x1x32xf32, #tpu.memory_space<vmem>>, %arg17: memref<1x1x32xf32, #tpu.memory_space<vmem>>, %arg18: memref<1x8x32xf32, #tpu.memory_space<vmem>>, %arg19: memref<8x32xf32, #tpu.memory_space<vmem>>) attributes {dimension_semantics = [#tpu.dimension_semantics<parallel>, #tpu.dimension_semantics<arbitrary>], iteration_bounds = array<i64: 2, 2>, scalar_prefetch = 0 : i64, scratch_operands = 1 : i64, tpu.core_type = #tpu.core_type<tc>, window_params = [{transform_indices = @transform_0, window_bounds = array<i64: 1, 8, 32>}, {pipeline_mode = #tpu.pipeline_mode<synchronous>, transform_indices = @transform_1, window_bounds = array<i64: 8, 8>}, {transform_indices = @transform_2, window_bounds = array<i64: 1, 96, 32>}, {transform_indices = @transform_3, window_bounds = array<i64: 1, 1, 32>}, {transform_indices = @transform_4, window_bounds = array<i64: 1, 32, 96>}, {transform_indices = @transform_5, window_bounds = array<i64: 1, 1, 96>}, {transform_indices = @transform_6, window_bounds = array<i64: 1, 32, 32>}, {transform_indices = @transform_7, window_bounds = array<i64: 1, 1, 32>}, {transform_indices = @transform_8, window_bounds = array<i64: 1, 1, 32>}, {transform_indices = @transform_9, window_bounds = array<i64: 1, 1, 32>}, {transform_indices = @transform_10, window_bounds = array<i64: 1, 32, 64>}, {transform_indices = @transform_11, window_bounds = array<i64: 1, 1, 64>}, {transform_indices = @transform_12, window_bounds = array<i64: 1, 64, 32>}, {transform_indices = @transform_13, window_bounds = array<i64: 1, 1, 32>}, {transform_indices = @transform_14, window_bounds = array<i64: 1, 1, 32>}, {transform_indices = @transform_15, window_bounds = array<i64: 1, 1, 32>}, {transform_indices = @transform_16, window_bounds = array<i64: 1, 8, 32>}]} {
    %c0_i32 = arith.constant 0 : i32
    %0 = arith.cmpi eq, %arg1, %c0_i32 : i32
    %1 = arith.extui %0 : i1 to i32
    %c0_i32_0 = arith.constant 0 : i32
    %2 = arith.cmpi ne, %1, %c0_i32_0 : i32
    scf.if %2 {
      %c0_92 = arith.constant 0 : index
      %c0_93 = arith.constant 0 : index
      %c0_94 = arith.constant 0 : index
      %224 = vector.load %arg2[%c0_92, %c0_93, %c0_94] : memref<1x8x32xf32, #tpu.memory_space<vmem>>, vector<1x8x32xf32>
      %225 = vector.shape_cast %224 : vector<1x8x32xf32> to vector<8x32xf32>
      %c0_95 = arith.constant 0 : index
      %c0_96 = arith.constant 0 : index
      %226 = vector.load %arg19[%c0_95, %c0_96] : memref<8x32xf32, #tpu.memory_space<vmem>>, vector<8x32xf32>
      tpu.vector_store %arg19[%c0_95, %c0_96], %225 {strides = array<i32>} : memref<8x32xf32, #tpu.memory_space<vmem>>, vector<8x32xf32>,
    } else {
    }
    %c0 = arith.constant 0 : index
    %c0_1 = arith.constant 0 : index
    %3 = vector.load %arg19[%c0, %c0_1] : memref<8x32xf32, #tpu.memory_space<vmem>>, vector<8x32xf32>
    %cst = arith.constant 0.000000e+00 : f32
    %4 = vector.broadcast %cst : f32 to vector<1x32xf32>
    %5 = vector.extract_strided_slice %3 {offsets = [0, 0], sizes = [7, 32], strides = [1, 1]} : vector<8x32xf32> to vector<7x32xf32>
    %6 = tpu.concatenate %4, %5 in 0 : vector<1x32xf32>, vector<7x32xf32> -> vector<8x32xf32>
    %7 = vector.extract_strided_slice %3 {offsets = [1, 0], sizes = [7, 32], strides = [1, 1]} : vector<8x32xf32> to vector<7x32xf32>
    %8 = tpu.concatenate %7, %4 in 0 : vector<7x32xf32>, vector<1x32xf32> -> vector<8x32xf32>
    %c0_2 = arith.constant 0 : index
    %c0_3 = arith.constant 0 : index
    %c0_4 = arith.constant 0 : index
    %9 = vector.load %arg4[%c0_2, %c0_3, %c0_4] : memref<1x96x32xbf16, #tpu.memory_space<vmem>>, vector<1x96x32xbf16>
    %10 = vector.shape_cast %9 : vector<1x96x32xbf16> to vector<96x32xbf16>
    %11 = arith.truncf %6 : vector<8x32xf32> to vector<8x32xbf16>
    %12 = vector.extract_strided_slice %10 {offsets = [0, 0], sizes = [32, 32], strides = [1, 1]} : vector<96x32xbf16> to vector<32x32xbf16>
    %cst_5 = arith.constant dense<0.000000e+00> : vector<8x32xf32>
    %13 = tpu.matmul %11, %12, %cst_5 {dimension_numbers = #tpu.dot_dimension_numbers<[1], [0], [0], [1], [0, 0, 1, 1], [], []>} : vector<8x32xbf16>, vector<32x32xbf16>, vector<8x32xf32> -> vector<8x32xf32>
    %14 = arith.truncf %3 : vector<8x32xf32> to vector<8x32xbf16>
    %15 = vector.extract_strided_slice %10 {offsets = [32, 0], sizes = [32, 32], strides = [1, 1]} : vector<96x32xbf16> to vector<32x32xbf16>
    %cst_6 = arith.constant dense<0.000000e+00> : vector<8x32xf32>
    %16 = tpu.matmul %14, %15, %cst_6 {dimension_numbers = #tpu.dot_dimension_numbers<[1], [0], [0], [1], [0, 0, 1, 1], [], []>} : vector<8x32xbf16>, vector<32x32xbf16>, vector<8x32xf32> -> vector<8x32xf32>
    %17 = arith.addf %13, %16 : vector<8x32xf32>
    %18 = arith.truncf %8 : vector<8x32xf32> to vector<8x32xbf16>
    %19 = vector.extract_strided_slice %10 {offsets = [64, 0], sizes = [32, 32], strides = [1, 1]} : vector<96x32xbf16> to vector<32x32xbf16>
    %cst_7 = arith.constant dense<0.000000e+00> : vector<8x32xf32>
    %20 = tpu.matmul %18, %19, %cst_7 {dimension_numbers = #tpu.dot_dimension_numbers<[1], [0], [0], [1], [0, 0, 1, 1], [], []>} : vector<8x32xbf16>, vector<32x32xbf16>, vector<8x32xf32> -> vector<8x32xf32>
    %21 = arith.addf %17, %20 : vector<8x32xf32>
    %c0_8 = arith.constant 0 : index
    %c0_9 = arith.constant 0 : index
    %c0_10 = arith.constant 0 : index
    %22 = vector.load %arg5[%c0_8, %c0_9, %c0_10] : memref<1x1x32xf32, #tpu.memory_space<vmem>>, vector<1x1x32xf32>
    %23 = vector.shape_cast %22 : vector<1x1x32xf32> to vector<1x32xf32>
    %24 = vector.broadcast %23 : vector<1x32xf32> to vector<8x32xf32>
    %25 = arith.addf %21, %24 : vector<8x32xf32>
    %26 = arith.addf %3, %25 : vector<8x32xf32>
    %27 = arith.truncf %26 : vector<8x32xf32> to vector<8x32xbf16>
    %c0_11 = arith.constant 0 : index
    %c0_12 = arith.constant 0 : index
    %c0_13 = arith.constant 0 : index
    %28 = vector.load %arg6[%c0_11, %c0_12, %c0_13] : memref<1x32x96xbf16, #tpu.memory_space<vmem>>, vector<1x32x96xbf16>
    %29 = vector.shape_cast %28 : vector<1x32x96xbf16> to vector<32x96xbf16>
    %cst_14 = arith.constant dense<0.000000e+00> : vector<8x96xf32>
    %30 = tpu.matmul %27, %29, %cst_14 {dimension_numbers = #tpu.dot_dimension_numbers<[1], [0], [0], [1], [0, 0, 1, 1], [], []>} : vector<8x32xbf16>, vector<32x96xbf16>, vector<8x96xf32> -> vector<8x96xf32>
    %c0_15 = arith.constant 0 : index
    %c0_16 = arith.constant 0 : index
    %c0_17 = arith.constant 0 : index
    %31 = vector.load %arg7[%c0_15, %c0_16, %c0_17] : memref<1x1x96xf32, #tpu.memory_space<vmem>>, vector<1x1x96xf32>
    %32 = vector.shape_cast %31 : vector<1x1x96xf32> to vector<1x96xf32>
    %33 = vector.broadcast %32 : vector<1x96xf32> to vector<8x96xf32>
    %34 = arith.addf %30, %33 : vector<8x96xf32>
    %35 = vector.extract_strided_slice %34 {offsets = [0, 0], sizes = [8, 32], strides = [1, 1]} : vector<8x96xf32> to vector<8x32xf32>
    %cst_18 = arith.constant 0.353553385 : f32
    %36 = vector.broadcast %cst_18 : f32 to vector<8x32xf32>
    %37 = arith.mulf %35, %36 : vector<8x32xf32>
    %38 = vector.extract_strided_slice %34 {offsets = [0, 32], sizes = [8, 32], strides = [1, 1]} : vector<8x96xf32> to vector<8x32xf32>
    %39 = vector.extract_strided_slice %34 {offsets = [0, 64], sizes = [8, 32], strides = [1, 1]} : vector<8x96xf32> to vector<8x32xf32>
    %c0_19 = arith.constant 0 : index
    %c0_20 = arith.constant 0 : index
    %40 = vector.load %arg3[%c0_19, %c0_20] : memref<8x8xf32, #tpu.memory_space<vmem>>, vector<8x8xf32>
    %c0_21 = arith.constant 0 : index
    %c0_22 = arith.constant 0 : index
    %c0_23 = arith.constant 0 : index
    %41 = vector.load %arg8[%c0_21, %c0_22, %c0_23] : memref<1x32x32xbf16, #tpu.memory_space<vmem>>, vector<1x32x32xbf16>
    %42 = vector.shape_cast %41 : vector<1x32x32xbf16> to vector<32x32xbf16>
    %cst_24 = arith.constant 0.000000e+00 : f32
    %43 = vector.broadcast %cst_24 : f32 to vector<8x32xf32>
    %44 = vector.extract_strided_slice %37 {offsets = [0, 0], sizes = [8, 8], strides = [1, 1]} : vector<8x32xf32> to vector<8x8xf32>
    %45 = arith.truncf %44 : vector<8x8xf32> to vector<8x8xbf16>
    %46 = vector.extract_strided_slice %38 {offsets = [0, 0], sizes = [8, 8], strides = [1, 1]} : vector<8x32xf32> to vector<8x8xf32>
    %47 = arith.truncf %46 : vector<8x8xf32> to vector<8x8xbf16>
    %cst_25 = arith.constant dense<0.000000e+00> : vector<8x8xf32>
    %48 = tpu.matmul %45, %47, %cst_25 {dimension_numbers = #tpu.dot_dimension_numbers<[1], [1], [0], [0], [0, 0, 1, 0], [], []>} : vector<8x8xbf16>, vector<8x8xbf16>, vector<8x8xf32> -> vector<8x8xf32>
    %49 = arith.addf %48, %40 : vector<8x8xf32>
    %cst_26 = arith.constant dense<0xFF800000> : vector<8xf32>
    %50 = vector.multi_reduction <maximumf>, %49, %cst_26 [1] : vector<8x8xf32> to vector<8xf32>
    %51 = vector.shape_cast %50 : vector<8xf32> to vector<8x1xf32>
    %52 = vector.broadcast %51 : vector<8x1xf32> to vector<8x8xf32>
    %53 = arith.subf %49, %52 : vector<8x8xf32>
    %54 = math.exp %53 : vector<8x8xf32>
    %cst_27 = arith.constant dense<0.000000e+00> : vector<8xf32>
    %55 = vector.multi_reduction <add>, %54, %cst_27 [1] : vector<8x8xf32> to vector<8xf32>
    %56 = vector.shape_cast %55 : vector<8xf32> to vector<8x1xf32>
    %cst_28 = arith.constant 1.000000e-30 : f32
    %57 = vector.broadcast %cst_28 : f32 to vector<8x1xf32>
    %58 = arith.maximumf %56, %57 : vector<8x1xf32>
    %59 = tpu.reciprocal %58 {approx = true} : vector<8x1xf32> -> vector<8x1xf32>
    %60 = vector.broadcast %59 : vector<8x1xf32> to vector<8x8xf32>
    %61 = arith.mulf %54, %60 : vector<8x8xf32>
    %62 = arith.truncf %61 : vector<8x8xf32> to vector<8x8xbf16>
    %63 = vector.extract_strided_slice %39 {offsets = [0, 0], sizes = [8, 8], strides = [1, 1]} : vector<8x32xf32> to vector<8x8xf32>
    %64 = arith.truncf %63 : vector<8x8xf32> to vector<8x8xbf16>
    %cst_29 = arith.constant dense<0.000000e+00> : vector<8x8xf32>
    %65 = tpu.matmul %62, %64, %cst_29 {dimension_numbers = #tpu.dot_dimension_numbers<[1], [0], [0], [1], [0, 0, 1, 1], [], []>} : vector<8x8xbf16>, vector<8x8xbf16>, vector<8x8xf32> -> vector<8x8xf32>
    %66 = arith.truncf %65 : vector<8x8xf32> to vector<8x8xbf16>
    %67 = vector.extract_strided_slice %42 {offsets = [0, 0], sizes = [8, 32], strides = [1, 1]} : vector<32x32xbf16> to vector<8x32xbf16>
    %cst_30 = arith.constant dense<0.000000e+00> : vector<8x32xf32>
    %68 = tpu.matmul %66, %67, %cst_30 {dimension_numbers = #tpu.dot_dimension_numbers<[1], [0], [0], [1], [0, 0, 1, 1], [], []>} : vector<8x8xbf16>, vector<8x32xbf16>, vector<8x32xf32> -> vector<8x32xf32>
    %69 = arith.addf %43, %68 : vector<8x32xf32>
    %70 = vector.extract_strided_slice %37 {offsets = [0, 8], sizes = [8, 8], strides = [1, 1]} : vector<8x32xf32> to vector<8x8xf32>
    %71 = arith.truncf %70 : vector<8x8xf32> to vector<8x8xbf16>
    %72 = vector.extract_strided_slice %38 {offsets = [0, 8], sizes = [8, 8], strides = [1, 1]} : vector<8x32xf32> to vector<8x8xf32>
    %73 = arith.truncf %72 : vector<8x8xf32> to vector<8x8xbf16>
    %cst_31 = arith.constant dense<0.000000e+00> : vector<8x8xf32>
    %74 = tpu.matmul %71, %73, %cst_31 {dimension_numbers = #tpu.dot_dimension_numbers<[1], [1], [0], [0], [0, 0, 1, 0], [], []>} : vector<8x8xbf16>, vector<8x8xbf16>, vector<8x8xf32> -> vector<8x8xf32>
    %75 = arith.addf %74, %40 : vector<8x8xf32>
    %cst_32 = arith.constant dense<0xFF800000> : vector<8xf32>
    %76 = vector.multi_reduction <maximumf>, %75, %cst_32 [1] : vector<8x8xf32> to vector<8xf32>
    %77 = vector.shape_cast %76 : vector<8xf32> to vector<8x1xf32>
    %78 = vector.broadcast %77 : vector<8x1xf32> to vector<8x8xf32>
    %79 = arith.subf %75, %78 : vector<8x8xf32>
    %80 = math.exp %79 : vector<8x8xf32>
    %cst_33 = arith.constant dense<0.000000e+00> : vector<8xf32>
    %81 = vector.multi_reduction <add>, %80, %cst_33 [1] : vector<8x8xf32> to vector<8xf32>
    %82 = vector.shape_cast %81 : vector<8xf32> to vector<8x1xf32>
    %cst_34 = arith.constant 1.000000e-30 : f32
    %83 = vector.broadcast %cst_34 : f32 to vector<8x1xf32>
    %84 = arith.maximumf %82, %83 : vector<8x1xf32>
    %85 = tpu.reciprocal %84 {approx = true} : vector<8x1xf32> -> vector<8x1xf32>
    %86 = vector.broadcast %85 : vector<8x1xf32> to vector<8x8xf32>
    %87 = arith.mulf %80, %86 : vector<8x8xf32>
    %88 = arith.truncf %87 : vector<8x8xf32> to vector<8x8xbf16>
    %89 = vector.extract_strided_slice %39 {offsets = [0, 8], sizes = [8, 8], strides = [1, 1]} : vector<8x32xf32> to vector<8x8xf32>
    %90 = arith.truncf %89 : vector<8x8xf32> to vector<8x8xbf16>
    %cst_35 = arith.constant dense<0.000000e+00> : vector<8x8xf32>
    %91 = tpu.matmul %88, %90, %cst_35 {dimension_numbers = #tpu.dot_dimension_numbers<[1], [0], [0], [1], [0, 0, 1, 1], [], []>} : vector<8x8xbf16>, vector<8x8xbf16>, vector<8x8xf32> -> vector<8x8xf32>
    %92 = arith.truncf %91 : vector<8x8xf32> to vector<8x8xbf16>
    %93 = vector.extract_strided_slice %42 {offsets = [8, 0], sizes = [8, 32], strides = [1, 1]} : vector<32x32xbf16> to vector<8x32xbf16>
    %cst_36 = arith.constant dense<0.000000e+00> : vector<8x32xf32>
    %94 = tpu.matmul %92, %93, %cst_36 {dimension_numbers = #tpu.dot_dimension_numbers<[1], [0], [0], [1], [0, 0, 1, 1], [], []>} : vector<8x8xbf16>, vector<8x32xbf16>, vector<8x32xf32> -> vector<8x32xf32>
    %95 = arith.addf %69, %94 : vector<8x32xf32>
    %96 = vector.extract_strided_slice %37 {offsets = [0, 16], sizes = [8, 8], strides = [1, 1]} : vector<8x32xf32> to vector<8x8xf32>
    %97 = arith.truncf %96 : vector<8x8xf32> to vector<8x8xbf16>
    %98 = vector.extract_strided_slice %38 {offsets = [0, 16], sizes = [8, 8], strides = [1, 1]} : vector<8x32xf32> to vector<8x8xf32>
    %99 = arith.truncf %98 : vector<8x8xf32> to vector<8x8xbf16>
    %cst_37 = arith.constant dense<0.000000e+00> : vector<8x8xf32>
    %100 = tpu.matmul %97, %99, %cst_37 {dimension_numbers = #tpu.dot_dimension_numbers<[1], [1], [0], [0], [0, 0, 1, 0], [], []>} : vector<8x8xbf16>, vector<8x8xbf16>, vector<8x8xf32> -> vector<8x8xf32>
    %101 = arith.addf %100, %40 : vector<8x8xf32>
    %cst_38 = arith.constant dense<0xFF800000> : vector<8xf32>
    %102 = vector.multi_reduction <maximumf>, %101, %cst_38 [1] : vector<8x8xf32> to vector<8xf32>
    %103 = vector.shape_cast %102 : vector<8xf32> to vector<8x1xf32>
    %104 = vector.broadcast %103 : vector<8x1xf32> to vector<8x8xf32>
    %105 = arith.subf %101, %104 : vector<8x8xf32>
    %106 = math.exp %105 : vector<8x8xf32>
    %cst_39 = arith.constant dense<0.000000e+00> : vector<8xf32>
    %107 = vector.multi_reduction <add>, %106, %cst_39 [1] : vector<8x8xf32> to vector<8xf32>
    %108 = vector.shape_cast %107 : vector<8xf32> to vector<8x1xf32>
    %cst_40 = arith.constant 1.000000e-30 : f32
    %109 = vector.broadcast %cst_40 : f32 to vector<8x1xf32>
    %110 = arith.maximumf %108, %109 : vector<8x1xf32>
    %111 = tpu.reciprocal %110 {approx = true} : vector<8x1xf32> -> vector<8x1xf32>
    %112 = vector.broadcast %111 : vector<8x1xf32> to vector<8x8xf32>
    %113 = arith.mulf %106, %112 : vector<8x8xf32>
    %114 = arith.truncf %113 : vector<8x8xf32> to vector<8x8xbf16>
    %115 = vector.extract_strided_slice %39 {offsets = [0, 16], sizes = [8, 8], strides = [1, 1]} : vector<8x32xf32> to vector<8x8xf32>
    %116 = arith.truncf %115 : vector<8x8xf32> to vector<8x8xbf16>
    %cst_41 = arith.constant dense<0.000000e+00> : vector<8x8xf32>
    %117 = tpu.matmul %114, %116, %cst_41 {dimension_numbers = #tpu.dot_dimension_numbers<[1], [0], [0], [1], [0, 0, 1, 1], [], []>} : vector<8x8xbf16>, vector<8x8xbf16>, vector<8x8xf32> -> vector<8x8xf32>
    %118 = arith.truncf %117 : vector<8x8xf32> to vector<8x8xbf16>
    %119 = vector.extract_strided_slice %42 {offsets = [16, 0], sizes = [8, 32], strides = [1, 1]} : vector<32x32xbf16> to vector<8x32xbf16>
    %cst_42 = arith.constant dense<0.000000e+00> : vector<8x32xf32>
    %120 = tpu.matmul %118, %119, %cst_42 {dimension_numbers = #tpu.dot_dimension_numbers<[1], [0], [0], [1], [0, 0, 1, 1], [], []>} : vector<8x8xbf16>, vector<8x32xbf16>, vector<8x32xf32> -> vector<8x32xf32>
    %121 = arith.addf %95, %120 : vector<8x32xf32>
    %122 = vector.extract_strided_slice %37 {offsets = [0, 24], sizes = [8, 8], strides = [1, 1]} : vector<8x32xf32> to vector<8x8xf32>
    %123 = arith.truncf %122 : vector<8x8xf32> to vector<8x8xbf16>
    %124 = vector.extract_strided_slice %38 {offsets = [0, 24], sizes = [8, 8], strides = [1, 1]} : vector<8x32xf32> to vector<8x8xf32>
    %125 = arith.truncf %124 : vector<8x8xf32> to vector<8x8xbf16>
    %cst_43 = arith.constant dense<0.000000e+00> : vector<8x8xf32>
    %126 = tpu.matmul %123, %125, %cst_43 {dimension_numbers = #tpu.dot_dimension_numbers<[1], [1], [0], [0], [0, 0, 1, 0], [], []>} : vector<8x8xbf16>, vector<8x8xbf16>, vector<8x8xf32> -> vector<8x8xf32>
    %127 = arith.addf %126, %40 : vector<8x8xf32>
    %cst_44 = arith.constant dense<0xFF800000> : vector<8xf32>
    %128 = vector.multi_reduction <maximumf>, %127, %cst_44 [1] : vector<8x8xf32> to vector<8xf32>
    %129 = vector.shape_cast %128 : vector<8xf32> to vector<8x1xf32>
    %130 = vector.broadcast %129 : vector<8x1xf32> to vector<8x8xf32>
    %131 = arith.subf %127, %130 : vector<8x8xf32>
    %132 = math.exp %131 : vector<8x8xf32>
    %cst_45 = arith.constant dense<0.000000e+00> : vector<8xf32>
    %133 = vector.multi_reduction <add>, %132, %cst_45 [1] : vector<8x8xf32> to vector<8xf32>
    %134 = vector.shape_cast %133 : vector<8xf32> to vector<8x1xf32>
    %cst_46 = arith.constant 1.000000e-30 : f32
    %135 = vector.broadcast %cst_46 : f32 to vector<8x1xf32>
    %136 = arith.maximumf %134, %135 : vector<8x1xf32>
    %137 = tpu.reciprocal %136 {approx = true} : vector<8x1xf32> -> vector<8x1xf32>
    %138 = vector.broadcast %137 : vector<8x1xf32> to vector<8x8xf32>
    %139 = arith.mulf %132, %138 : vector<8x8xf32>
    %140 = arith.truncf %139 : vector<8x8xf32> to vector<8x8xbf16>
    %141 = vector.extract_strided_slice %39 {offsets = [0, 24], sizes = [8, 8], strides = [1, 1]} : vector<8x32xf32> to vector<8x8xf32>
    %142 = arith.truncf %141 : vector<8x8xf32> to vector<8x8xbf16>
    %cst_47 = arith.constant dense<0.000000e+00> : vector<8x8xf32>
    %143 = tpu.matmul %140, %142, %cst_47 {dimension_numbers = #tpu.dot_dimension_numbers<[1], [0], [0], [1], [0, 0, 1, 1], [], []>} : vector<8x8xbf16>, vector<8x8xbf16>, vector<8x8xf32> -> vector<8x8xf32>
    %144 = arith.truncf %143 : vector<8x8xf32> to vector<8x8xbf16>
    %145 = vector.extract_strided_slice %42 {offsets = [24, 0], sizes = [8, 32], strides = [1, 1]} : vector<32x32xbf16> to vector<8x32xbf16>
    %cst_48 = arith.constant dense<0.000000e+00> : vector<8x32xf32>
    %146 = tpu.matmul %144, %145, %cst_48 {dimension_numbers = #tpu.dot_dimension_numbers<[1], [0], [0], [1], [0, 0, 1, 1], [], []>} : vector<8x8xbf16>, vector<8x32xbf16>, vector<8x32xf32> -> vector<8x32xf32>
    %147 = arith.addf %121, %146 : vector<8x32xf32>
    %c0_49 = arith.constant 0 : index
    %c0_50 = arith.constant 0 : index
    %c0_51 = arith.constant 0 : index
    %148 = vector.load %arg9[%c0_49, %c0_50, %c0_51] : memref<1x1x32xf32, #tpu.memory_space<vmem>>, vector<1x1x32xf32>
    %149 = vector.shape_cast %148 : vector<1x1x32xf32> to vector<1x32xf32>
    %150 = vector.broadcast %149 : vector<1x32xf32> to vector<8x32xf32>
    %151 = arith.addf %147, %150 : vector<8x32xf32>
    %152 = arith.addf %26, %151 : vector<8x32xf32>
    %cst_52 = arith.constant dense<0.000000e+00> : vector<8xf32>
    %153 = vector.multi_reduction <add>, %152, %cst_52 [1] : vector<8x32xf32> to vector<8xf32>
    %154 = vector.shape_cast %153 : vector<8xf32> to vector<8x1xf32>
    %cst_53 = arith.constant 3.200000e+01 : f32
    %155 = vector.broadcast %cst_53 : f32 to vector<8x1xf32>
    %156 = arith.divf %154, %155 : vector<8x1xf32>
    %157 = vector.broadcast %156 : vector<8x1xf32> to vector<8x32xf32>
    %158 = arith.subf %152, %157 : vector<8x32xf32>
    %159 = arith.mulf %158, %158 : vector<8x32xf32>
    %cst_54 = arith.constant dense<0.000000e+00> : vector<8xf32>
    %160 = vector.multi_reduction <add>, %159, %cst_54 [1] : vector<8x32xf32> to vector<8xf32>
    %161 = vector.shape_cast %160 : vector<8xf32> to vector<8x1xf32>
    %cst_55 = arith.constant 3.200000e+01 : f32
    %162 = vector.broadcast %cst_55 : f32 to vector<8x1xf32>
    %163 = arith.divf %161, %162 : vector<8x1xf32>
    %cst_56 = arith.constant 9.99999974E-6 : f32
    %164 = vector.broadcast %cst_56 : f32 to vector<8x1xf32>
    %165 = arith.addf %163, %164 : vector<8x1xf32>
    %166 = math.rsqrt %165 : vector<8x1xf32>
    %167 = vector.broadcast %166 : vector<8x1xf32> to vector<8x32xf32>
    %168 = arith.mulf %158, %167 : vector<8x32xf32>
    %c0_57 = arith.constant 0 : index
    %c0_58 = arith.constant 0 : index
    %c0_59 = arith.constant 0 : index
    %169 = vector.load %arg10[%c0_57, %c0_58, %c0_59] : memref<1x1x32xf32, #tpu.memory_space<vmem>>, vector<1x1x32xf32>
    %170 = vector.shape_cast %169 : vector<1x1x32xf32> to vector<1x32xf32>
    %171 = vector.broadcast %170 : vector<1x32xf32> to vector<8x32xf32>
    %172 = arith.mulf %168, %171 : vector<8x32xf32>
    %c0_60 = arith.constant 0 : index
    %c0_61 = arith.constant 0 : index
    %c0_62 = arith.constant 0 : index
    %173 = vector.load %arg11[%c0_60, %c0_61, %c0_62] : memref<1x1x32xf32, #tpu.memory_space<vmem>>, vector<1x1x32xf32>
    %174 = vector.shape_cast %173 : vector<1x1x32xf32> to vector<1x32xf32>
    %175 = vector.broadcast %174 : vector<1x32xf32> to vector<8x32xf32>
    %176 = arith.addf %172, %175 : vector<8x32xf32>
    %177 = arith.truncf %176 : vector<8x32xf32> to vector<8x32xbf16>
    %c0_63 = arith.constant 0 : index
    %c0_64 = arith.constant 0 : index
    %c0_65 = arith.constant 0 : index
    %178 = vector.load %arg12[%c0_63, %c0_64, %c0_65] : memref<1x32x64xbf16, #tpu.memory_space<vmem>>, vector<1x32x64xbf16>
    %179 = vector.shape_cast %178 : vector<1x32x64xbf16> to vector<32x64xbf16>
    %cst_66 = arith.constant dense<0.000000e+00> : vector<8x64xf32>
    %180 = tpu.matmul %177, %179, %cst_66 {dimension_numbers = #tpu.dot_dimension_numbers<[1], [0], [0], [1], [0, 0, 1, 1], [], []>} : vector<8x32xbf16>, vector<32x64xbf16>, vector<8x64xf32> -> vector<8x64xf32>
    %c0_67 = arith.constant 0 : index
    %c0_68 = arith.constant 0 : index
    %c0_69 = arith.constant 0 : index
    %181 = vector.load %arg13[%c0_67, %c0_68, %c0_69] : memref<1x1x64xf32, #tpu.memory_space<vmem>>, vector<1x1x64xf32>
    %182 = vector.shape_cast %181 : vector<1x1x64xf32> to vector<1x64xf32>
    %183 = vector.broadcast %182 : vector<1x64xf32> to vector<8x64xf32>
    %184 = arith.addf %180, %183 : vector<8x64xf32>
    %cst_70 = arith.constant 0.000000e+00 : f32
    %185 = vector.broadcast %cst_70 : f32 to vector<8x64xf32>
    %186 = arith.maximumf %184, %185 : vector<8x64xf32>
    %187 = arith.truncf %186 : vector<8x64xf32> to vector<8x64xbf16>
    %c0_71 = arith.constant 0 : index
    %c0_72 = arith.constant 0 : index
    %c0_73 = arith.constant 0 : index
    %188 = vector.load %arg14[%c0_71, %c0_72, %c0_73] : memref<1x64x32xbf16, #tpu.memory_space<vmem>>, vector<1x64x32xbf16>
    %189 = vector.shape_cast %188 : vector<1x64x32xbf16> to vector<64x32xbf16>
    %cst_74 = arith.constant dense<0.000000e+00> : vector<8x32xf32>
    %190 = tpu.matmul %187, %189, %cst_74 {dimension_numbers = #tpu.dot_dimension_numbers<[1], [0], [0], [1], [0, 0, 1, 1], [], []>} : vector<8x64xbf16>, vector<64x32xbf16>, vector<8x32xf32> -> vector<8x32xf32>
    %c0_75 = arith.constant 0 : index
    %c0_76 = arith.constant 0 : index
    %c0_77 = arith.constant 0 : index
    %191 = vector.load %arg15[%c0_75, %c0_76, %c0_77] : memref<1x1x32xf32, #tpu.memory_space<vmem>>, vector<1x1x32xf32>
    %192 = vector.shape_cast %191 : vector<1x1x32xf32> to vector<1x32xf32>
    %193 = vector.broadcast %192 : vector<1x32xf32> to vector<8x32xf32>
    %194 = arith.addf %190, %193 : vector<8x32xf32>
    %195 = arith.addf %176, %194 : vector<8x32xf32>
    %cst_78 = arith.constant dense<0.000000e+00> : vector<8xf32>
    %196 = vector.multi_reduction <add>, %195, %cst_78 [1] : vector<8x32xf32> to vector<8xf32>
    %197 = vector.shape_cast %196 : vector<8xf32> to vector<8x1xf32>
    %cst_79 = arith.constant 3.200000e+01 : f32
    %198 = vector.broadcast %cst_79 : f32 to vector<8x1xf32>
    %199 = arith.divf %197, %198 : vector<8x1xf32>
    %200 = vector.broadcast %199 : vector<8x1xf32> to vector<8x32xf32>
    %201 = arith.subf %195, %200 : vector<8x32xf32>
    %202 = arith.mulf %201, %201 : vector<8x32xf32>
    %cst_80 = arith.constant dense<0.000000e+00> : vector<8xf32>
    %203 = vector.multi_reduction <add>, %202, %cst_80 [1] : vector<8x32xf32> to vector<8xf32>
    %204 = vector.shape_cast %203 : vector<8xf32> to vector<8x1xf32>
    %cst_81 = arith.constant 3.200000e+01 : f32
    %205 = vector.broadcast %cst_81 : f32 to vector<8x1xf32>
    %206 = arith.divf %204, %205 : vector<8x1xf32>
    %cst_82 = arith.constant 9.99999974E-6 : f32
    %207 = vector.broadcast %cst_82 : f32 to vector<8x1xf32>
    %208 = arith.addf %206, %207 : vector<8x1xf32>
    %209 = math.rsqrt %208 : vector<8x1xf32>
    %210 = vector.broadcast %209 : vector<8x1xf32> to vector<8x32xf32>
    %211 = arith.mulf %201, %210 : vector<8x32xf32>
    %c0_83 = arith.constant 0 : index
    %c0_84 = arith.constant 0 : index
    %c0_85 = arith.constant 0 : index
    %212 = vector.load %arg16[%c0_83, %c0_84, %c0_85] : memref<1x1x32xf32, #tpu.memory_space<vmem>>, vector<1x1x32xf32>
    %213 = vector.shape_cast %212 : vector<1x1x32xf32> to vector<1x32xf32>
    %214 = vector.broadcast %213 : vector<1x32xf32> to vector<8x32xf32>
    %215 = arith.mulf %211, %214 : vector<8x32xf32>
    %c0_86 = arith.constant 0 : index
    %c0_87 = arith.constant 0 : index
    %c0_88 = arith.constant 0 : index
    %216 = vector.load %arg17[%c0_86, %c0_87, %c0_88] : memref<1x1x32xf32, #tpu.memory_space<vmem>>, vector<1x1x32xf32>
    %217 = vector.shape_cast %216 : vector<1x1x32xf32> to vector<1x32xf32>
    %218 = vector.broadcast %217 : vector<1x32xf32> to vector<8x32xf32>
    %219 = arith.addf %215, %218 : vector<8x32xf32>
    %c0_89 = arith.constant 0 : index
    %c0_90 = arith.constant 0 : index
    %220 = vector.load %arg19[%c0_89, %c0_90] : memref<8x32xf32, #tpu.memory_space<vmem>>, vector<8x32xf32>
    tpu.vector_store %arg19[%c0_89, %c0_90], %219 {strides = array<i32>} : memref<8x32xf32, #tpu.memory_space<vmem>>, vector<8x32xf32>,
    %c1_i32 = arith.constant 1 : i32
    %221 = arith.cmpi eq, %arg1, %c1_i32 : i32
    %222 = arith.extui %221 : i1 to i32
    %c0_i32_91 = arith.constant 0 : i32
    %223 = arith.cmpi ne, %222, %c0_i32_91 : i32
    scf.if %223 {
      %224 = arith.addf %219, %25 : vector<8x32xf32>
      %c0_92 = arith.constant 0 : index
      %c0_93 = arith.constant 0 : index
      %c0_94 = arith.constant 0 : index
      %225 = vector.load %arg18[%c0_92, %c0_93, %c0_94] : memref<1x8x32xf32, #tpu.memory_space<vmem>>, vector<1x8x32xf32>
      %226 = vector.shape_cast %225 : vector<1x8x32xf32> to vector<8x32xf32>
      %227 = vector.shape_cast %224 : vector<8x32xf32> to vector<1x8x32xf32>
      tpu.vector_store %arg18[%c0_92, %c0_93, %c0_94], %227 {strides = array<i32>} : memref<1x8x32xf32, #tpu.memory_space<vmem>>, vector<1x8x32xf32>,
    } else {
    }
    return
  }
  func.func @transform_0(%arg0: i32, %arg1: i32) -> (i32, i32, i32) {
    %c0_i32 = arith.constant 0 : i32
    %c0_i32_0 = arith.constant 0 : i32
    %c0_i32_1 = arith.constant 0 : i32
    return %arg0, %c0_i32, %c0_i32_0 : i32, i32, i32
  }
  func.func @transform_1(%arg0: i32, %arg1: i32) -> (i32, i32) {
    %c0_i32 = arith.constant 0 : i32
    %c0_i32_0 = arith.constant 0 : i32
    %c0_i32_1 = arith.constant 0 : i32
    return %c0_i32, %c0_i32_0 : i32, i32
  }
  func.func @transform_2(%arg0: i32, %arg1: i32) -> (i32, i32, i32) {
    %c0_i32 = arith.constant 0 : i32
    %c0_i32_0 = arith.constant 0 : i32
    %c0_i32_1 = arith.constant 0 : i32
    return %arg1, %c0_i32, %c0_i32_0 : i32, i32, i32
  }
  func.func @transform_3(%arg0: i32, %arg1: i32) -> (i32, i32, i32) {
    %c0_i32 = arith.constant 0 : i32
    %c0_i32_0 = arith.constant 0 : i32
    %c0_i32_1 = arith.constant 0 : i32
    return %arg1, %c0_i32, %c0_i32_0 : i32, i32, i32
  }
  func.func @transform_4(%arg0: i32, %arg1: i32) -> (i32, i32, i32) {
    %c0_i32 = arith.constant 0 : i32
    %c0_i32_0 = arith.constant 0 : i32
    %c0_i32_1 = arith.constant 0 : i32
    return %arg1, %c0_i32, %c0_i32_0 : i32, i32, i32
  }
  func.func @transform_5(%arg0: i32, %arg1: i32) -> (i32, i32, i32) {
    %c0_i32 = arith.constant 0 : i32
    %c0_i32_0 = arith.constant 0 : i32
    %c0_i32_1 = arith.constant 0 : i32
    return %arg1, %c0_i32, %c0_i32_0 : i32, i32, i32
  }
  func.func @transform_6(%arg0: i32, %arg1: i32) -> (i32, i32, i32) {
    %c0_i32 = arith.constant 0 : i32
    %c0_i32_0 = arith.constant 0 : i32
    %c0_i32_1 = arith.constant 0 : i32
    return %arg1, %c0_i32, %c0_i32_0 : i32, i32, i32
  }
  func.func @transform_7(%arg0: i32, %arg1: i32) -> (i32, i32, i32) {
    %c0_i32 = arith.constant 0 : i32
    %c0_i32_0 = arith.constant 0 : i32
    %c0_i32_1 = arith.constant 0 : i32
    return %arg1, %c0_i32, %c0_i32_0 : i32, i32, i32
  }
  func.func @transform_8(%arg0: i32, %arg1: i32) -> (i32, i32, i32) {
    %c0_i32 = arith.constant 0 : i32
    %c0_i32_0 = arith.constant 0 : i32
    %c0_i32_1 = arith.constant 0 : i32
    return %arg1, %c0_i32, %c0_i32_0 : i32, i32, i32
  }
  func.func @transform_9(%arg0: i32, %arg1: i32) -> (i32, i32, i32) {
    %c0_i32 = arith.constant 0 : i32
    %c0_i32_0 = arith.constant 0 : i32
    %c0_i32_1 = arith.constant 0 : i32
    return %arg1, %c0_i32, %c0_i32_0 : i32, i32, i32
  }
  func.func @transform_10(%arg0: i32, %arg1: i32) -> (i32, i32, i32) {
    %c0_i32 = arith.constant 0 : i32
    %c0_i32_0 = arith.constant 0 : i32
    %c0_i32_1 = arith.constant 0 : i32
    return %arg1, %c0_i32, %c0_i32_0 : i32, i32, i32
  }
  func.func @transform_11(%arg0: i32, %arg1: i32) -> (i32, i32, i32) {
    %c0_i32 = arith.constant 0 : i32
    %c0_i32_0 = arith.constant 0 : i32
    %c0_i32_1 = arith.constant 0 : i32
    return %arg1, %c0_i32, %c0_i32_0 : i32, i32, i32
  }
  func.func @transform_12(%arg0: i32, %arg1: i32) -> (i32, i32, i32) {
    %c0_i32 = arith.constant 0 : i32
    %c0_i32_0 = arith.constant 0 : i32
    %c0_i32_1 = arith.constant 0 : i32
    return %arg1, %c0_i32, %c0_i32_0 : i32, i32, i32
  }
  func.func @transform_13(%arg0: i32, %arg1: i32) -> (i32, i32, i32) {
    %c0_i32 = arith.constant 0 : i32
    %c0_i32_0 = arith.constant 0 : i32
    %c0_i32_1 = arith.constant 0 : i32
    return %arg1, %c0_i32, %c0_i32_0 : i32, i32, i32
  }
  func.func @transform_14(%arg0: i32, %arg1: i32) -> (i32, i32, i32) {
    %c0_i32 = arith.constant 0 : i32
    %c0_i32_0 = arith.constant 0 : i32
    %c0_i32_1 = arith.constant 0 : i32
    return %arg1, %c0_i32, %c0_i32_0 : i32, i32, i32
  }
  func.func @transform_15(%arg0: i32, %arg1: i32) -> (i32, i32, i32) {
    %c0_i32 = arith.constant 0 : i32
    %c0_i32_0 = arith.constant 0 : i32
    %c0_i32_1 = arith.constant 0 : i32
    return %arg1, %c0_i32, %c0_i32_0 : i32, i32, i32
  }
  func.func @transform_16(%arg0: i32, %arg1: i32) -> (i32, i32, i32) {
    %c0_i32 = arith.constant 0 : i32
    %c0_i32_0 = arith.constant 0 : i32
    %c0_i32_1 = arith.constant 0 : i32
    return %arg0, %c0_i32, %c0_i32_0 : i32, i32, i32
  }
}

</mosaic_0001>

<bundles_post_ra>
// kernel: localformer_encoder.1
= control target key start
LH: loop header
LB: loop body
LE: loop exit
PB: predicated region body
PF: predicated region fallthrough
CT: control target
= control target key end

     0   :  { %s3080_s0 = inlined_call_operand.vmem [shape: f32[2,8,32], index: 0, kind: input, shape index: {}]   ;;  %s3081_s1 = inlined_call_operand.vmem [shape: f32[8,8], index: 1, kind: input, shape index: {}]   ;;  %s3082_s2 = inlined_call_operand.vmem [shape: bf16[2,96,32], index: 2, kind: input, shape index: {}]   ;;  %s3083_s3 = inlined_call_operand.vmem [shape: f32[2,1,32], index: 3, kind: input, shape index: {}]   ;;  %s3084_s4 = inlined_call_operand.vmem [shape: bf16[2,32,96], index: 4, kind: input, shape index: {}]   ;;  %s3085_s5 = inlined_call_operand.vmem [shape: f32[2,1,96], index: 5, kind: input, shape index: {}]   ;;  %s3086_s6 = inlined_call_operand.vmem [shape: bf16[2,32,32], index: 6, kind: input, shape index: {}]   ;;  %s3087_s7 = inlined_call_operand.vmem [shape: f32[2,1,32], index: 7, kind: input, shape index: {}]   ;;  %s3088_s8 = inlined_call_operand.vmem [shape: f32[2,1,32], index: 8, kind: input, shape index: {}]   ;;  %s3089_s9 = inlined_call_operand.vmem [shape: f32[2,1,32], index: 9, kind: input, shape index: {}]   ;;  %s3090_s10 = inlined_call_operand.vmem [shape: bf16[2,32,64], index: 10, kind: input, shape index: {}]   ;;  %s3091_s11 = inlined_call_operand.vmem [shape: f32[2,1,64], index: 11, kind: input, shape index: {}]   ;;  %s3092_s12 = inlined_call_operand.vmem [shape: bf16[2,64,32], index: 12, kind: input, shape index: {}]   ;;  %s3093_s13 = inlined_call_operand.vmem [shape: f32[2,1,32], index: 13, kind: input, shape index: {}]   ;;  %s3094_s14 = inlined_call_operand.vmem [shape: f32[2,1,32], index: 14, kind: input, shape index: {}]   ;;  %s3095_s15 = inlined_call_operand.vmem [shape: f32[2,1,32], index: 15, kind: input, shape index: {}]   ;;  %s3096_s16 = inlined_call_operand.hbm [shape: f32[2,8,32], index: 16, kind: output, shape index: {}]  }
   0x1   :  { %3113 = sst [smem:[#allocation20_spill]] %s3080_s0 }
   0x2   :  { %3114 = sst [smem:[#allocation21_spill]] %s3081_s1 }
   0x3   :  { %3115 = sst [smem:[#allocation22_spill]] %s3082_s2 }
   0x4   :  { %3116 = sst [smem:[#allocation23_spill]] %s3083_s3 }
   0x5   :  { %3117 = sst [smem:[#allocation24_spill]] %s3084_s4 }
   0x6   :  { %3118 = sst [smem:[#allocation25_spill]] %s3086_s6 }
   0x7   :  { %3119 = sst [smem:[#allocation26_spill]] %s3090_s10 }
   0x8   :  { %3120 = sst [smem:[#allocation27_spill]] %s3095_s15 }
   0x9   :  { %3121 = sst [smem:[#allocation28_spill]] %s3096_s16 }
   0xa   :  { %21 = vsyncpa [#allocation4], 0 }
   0xb   :  { %23 = vsyncpa [#allocation4 + $0x1], 0  ;;  %s2675_s21 = smov 0   ;;  %s2677_s22 = smov 0  }
   0xc   :  { %s2679_s23 = smov 0   ;;  %s2681_s24 = smov 0  }
   0xd   :  { %s2683_s25 = smov 0   ;;  %s2685_s26 = smov 0  }
   0xe   :  { %s2687_s27 = smov 0   ;;  %s2689_s28 = smov 0  }
   0xf LB: > { %3122 = sst [smem:[#allocation6_spill]] %s2546_s21  ;;  %s2128_s29 = sadd.s32 4294967295, %s2574_s28   ;;  %s2574_s28 = sphi %s2689_s28, %s29_s28   ;;  %s2570_s27 = sphi %s2687_s27, %s3171_s27   ;;  %s2566_s26 = sphi %s2685_s26, %s3170_s26   ;;  %s2562_s25 = sphi %s2683_s25, %s3169_s25   ;;  %s2558_s24 = sphi %s2681_s24, %s3168_s24   ;;  %s2554_s23 = sphi %s2679_s23, %s3167_s23   ;;  %s2550_s22 = sphi %s2677_s22, %s3166_s22   ;;  %s2546_s21 = sphi %s2675_s21, %s3165_s21  }
  0x10   : > { %3123 = sst [smem:[#allocation7_spill]] %s2550_s22  ;;  %s2129_s30 = sadd.s32 4294967294, %s2574_s28  }
  0x11   : > { %3124 = sst [smem:[#allocation8_spill]] %s2554_s23  ;;  %s38_s0 = sadd.s32 1, %s2566_s26 }
  0x12   : > { %3125 = sst [smem:[#allocation9_spill]] %s2558_s24  ;;  %p39_p0 = scmp.ge.s32.totalorder %s38_s0, 2 }
  0x13   : > { %3126 = sst [smem:[#allocation10_spill]] %s2562_s25  ;;  %s41_s17 = sadd.s32 1, %s2570_s27 }
  0x14   : > { %3127 = sst [smem:[#allocation11_spill]] %s2566_s26  ;;  %p469_p1 = scmp.ne.s32.totalorder %s2554_s23, %s2550_s22 }
  0x15   : > { %3128 = sst [smem:[#allocation12_spill]] %s2570_s27  ;;  %p470_p2 = scmp.eq.s32.totalorder %s2128_s29, 3 }
  0x16   : > { %3129 = sst [smem:[#allocation13_spill]] %s2574_s28  ;;  %s3173_s0 = smov (%p39_p0, %s38_s0), 0 }
  0x17   : > { %3130 = sst [smem:[#allocation14_spill]] %s3173_s0  ;;  %s3175_s17 = smov (!%p39_p0, %s41_s17), %s2570_s27 }
  0x18   : > { %p2724_p3 = por %p470_p2, %p469_p1  ;;  %p475_p4 = scmp.ne.s32.totalorder %s2550_s22, %s2546_s21 }
  0x19   : > { %p43_p5 = scmp.ge.s32.totalorder %s3175_s17, 2  ;;  %p476_p6 = scmp.eq.s32.totalorder %s2129_s30, 3 }
  0x1a   : > { %s3131_s18 = scalar_select %p2724_p3, 1, 0 }
  0x1b   : > { %p2132_p7 = scmp.ge.s32.totalorder %s2574_s28, 1  ;;  %p598_p8 = scmp.lt.s32.totalorder %s2574_s28, 5 }
  0x1c   : > { %3132 = sst [smem:[#allocation15_spill]] %s3131_s18  ;;  %s3177_s17 = smov (%p43_p5, %s3175_s17), 0 }
  0x1d   : > { %3133 = sst [smem:[#allocation16_spill]] %s3177_s17  ;;  %p2734_p9 = por %p476_p6, %p475_p4 }
  0x1e   : > { %p599_p10 = pnand %p2132_p7, %p598_p8  ;;  %s456_s20 = ssub.s32 %s2570_s27, %s3177_s17 }
  0x1f   : > { %s3134_s19 = scalar_select %p2734_p9, 1, 0 }
  0x20   : > { %s459_s29 = sadd.s32 1, %s2554_s23  ;;  %p457_p11 = scmp.eq.s32.totalorder %s456_s20, 0 }
  0x21   : > { %3135 = sst [smem:[#allocation17_spill]] %s3134_s19  ;;  %602 = sbr.rel (%p599_p10) target bundleno = 3791 (0xecf), region = 84 }
  0x22   : > { %s2742_s0 = scalar_select %p457_p11, %s2554_s23, %s459_s29  }
  0x24   : > { %3136 = sst [smem:[#allocation18_spill]] %s2742_s0 }
  0x26   : > { %s3102_s30 = sand.u32 1, %s2550_s22   ;;  %p699_p12 = scmp.lt.s32.totalorder %s2562_s25, 1 }
  0x27   : > { %s2748_s26 = sshll.u32 %s3102_s30, 3  ;;  %p703_p13 = scmp.lt.s32.totalorder %s2558_s24, 1 }
  0x28   : > { %s700_s19 = scalar_select %p699_p12, %s2562_s25, 1 }
  0x29   : > { %s2753_s21 = scalar_select %p703_p13, %s2558_s24, 1 }
  0x2a   : > { %s2134_s20 = sshll.u32 %s700_s19, 3  ;;  %s3137_s27 = sld [smem:[#allocation20_spill]] }
  0x2b   : > { %s2363_s0 = smul.u32 48, %s2753_s21  ;;  %s2191_s18 = sshll.u32 %s2753_s21, 4 }
  0x2c   : > { %s3139_s2 = sld [smem:[#allocation22_spill]]  ;;  %s740_s29 = scalar_lea.vmem %s3091_s11, %s2753_s21 }
  0x2d   : > { %s3140_s4 = sld [smem:[#allocation24_spill]]  ;;  %s748_s24 = scalar_lea.vmem %s3093_s13, %s2753_s21 }
  0x2e   : > { %s3142_s6 = sld [smem:[#allocation25_spill]]  ;;  %s698_s15 = scalar_lea.vmem [#allocation3], %s2748_s26 }
  0x2f   : > { %s3143_s10 = sld [smem:[#allocation26_spill]] }
  0x30   : > { %s702_s30 = scalar_lea.vmem %s3137_s27, %s2134_s20  ;;  %s3145_s23 = sld [smem:[#allocation9_spill]] }
  0x32   : > { %s2767_s1 = scalar_lea.vmem %s3139_s2, %s2363_s0  ;;  %s3144_s2 = sld [smem:[#allocation27_spill]] }
  0x33   : > { %s2772_s17 = scalar_lea.vmem %s3140_s4, %s2191_s18 }
  0x34   : > { %3141 = sst [smem:[#allocation19_spill]] %s2772_s17  ;;  %s2781_s28 = scalar_lea.vmem %s3142_s6, %s2191_s18 }
  0x35   : > { %s2798_s20 = scalar_lea.vmem %s3143_s10, %s2191_s18  ;;  %s2194_s6 = sshll.u32 %s2753_s21, 5 }
  0x36   : > { %s2808_s22 = scalar_lea.vmem %s3092_s12, %s2194_s6  ;;  %s751_s17 = scalar_lea.vmem %s3094_s14, %s2753_s21 }
  0x37   : > { %p2144_p0 = scmp.ne.s32.totalorder %s3145_s23, 0 }
  0x38   : > { %s754_s10 = scalar_lea.vmem %s3144_s2, %s2753_s21 }
  0x39   : > { %759 = sbr.rel (%p2144_p0) target bundleno = 64 (0x40), region = 88 }
  0x3e   : > { %v760_v0 = vld [vmem:[%s702_s30] sm:$0xff]  ;;  %vm761_vm0 = vcmask 261120  }
  0x3f   : > { %762 = vst.msk [vmem:[#allocation2] sm:$0xff] %vm761_vm0, %v760_v0 }
  0x40 PF: > { %v2448_v1 = vld [vmem:[%s2767_s1 + $0x18] sm:$0xff]   ;;  %v2576_v2 = vmov 0.0   ;;  %v2449_v3 = vld [vmem:[%s2767_s1 + $0x8] sm:$0xff]   ;;  %v2450_v4 = vld [vmem:[%s2767_s1 + $0x10] sm:$0xff]   ;;  %vm2577_vm1 = vmmov 0   ;;  %vm799_vm2 = vcmask 261120   ;;  %s3149_s25 = scalar_lea.vmem %s3085_s5, %s2753_s21  ;;  %s3152_s23 = scalar_lea.vmem %s3088_s8, %s2753_s21 }
  0x41   : > { %2239 = vmatprep.subr.bf16.mxu0 %v2576_v2  ;;  %2247 = vmatprep.subr.bf16.mxu1 %v2576_v2  ;;  %v2451_v5 = vld [vmem:[%s2767_s1] sm:$0xff]   ;;  %vm767_vm3 = vcmask 1040384   ;;  %vm771_vm4 = vcmask 1046528   ;;  %v2452_v9 = vld [vmem:[%s2767_s1 + $0x28] sm:$0xff]   ;;  %s3146_s2 = sld [smem:[#allocation19_spill]]  ;;  %s2578_s0 = smov 96  }
  0x42   : > { %2240 = vmatpush3.bf16.msra.mxu0 %v2448_v1  ;;  %2243 = vmatprep.mubr.msk.bf16.mxu0 %vm2577_vm1, %v2576_v2  ;;  %v2453_v13 = vld [vmem:[%s2767_s1 + $0x20] sm:$0xff]   ;;  %s3147_s6 = sld [smem:[#allocation23_spill]]  ;;  %s2579_s19 = smov 120   ;;  %vm1042_vm5 = vcmask 64512   ;;  %vm1107_vm6 = vcmask 1043456   ;;  %vm1822_vm7 = vcmask 523264  }
  0x43   : > { %2248 = vmatpush3.bf16.msra.mxu1 %v2449_v3  ;;  %2241 = vmatprep.subr.bf16.mxu0 %v2576_v2  ;;  %v2155_v36 = vld [vmem:[%s3149_s25] ss:$0 sm:$0xff]  ;;  %s2580_s18 = smov 88   ;;  %s2581_s1 = smov 64  }
  0x44   : > { %2249 = vmatprep.subr.bf16.mxu1 %v2576_v2  ;;  %2251 = vmatprep.mubr.msk.bf16.mxu1 %vm2577_vm1, %v2576_v2  ;;  %s2582_s4 = smov 56   ;;  %s2585_s3 = smov 72  }
  0x45   : > { %s2586_s16 = smov 104   ;;  %s2587_s25 = smov 48  }
  0x46   : > { %v763_v6 = vld [vmem:[#allocation2] sm:$0xff]  ;;  %2242 = vmatpush3.bf16.msra.mxu0 %v2450_v4 }
  0x47   : > { %v786_v7 = vpack.c.bf16 %v763_v6, %v763_v6  ;;  %v765_v8 = vrot.slane %v763_v6, 7  ;;  %v769_v10 = vrot.slane %v763_v6, 1  ;;  %2250 = vmatpush3.bf16.msra.mxu1 %v2451_v5  ;;  %2255 = vmatprep.subr.bf16.mxu0 %v2576_v2  ;;  %v2454_v16 = vld [vmem:[%s3146_s2 + $0x8] sm:$0xff]   ;;  %v2455_v17 = vld [vmem:[%s3146_s2] sm:$0xff]   ;;  %s3150_s2 = sld [smem:[#allocation21_spill]] }
  0x48   : > { %2263 = vmatprep.subr.bf16.mxu1 %v2576_v2  ;;  %s3148_s30 = scalar_lea.vmem %s3147_s6, %s2753_s21  ;;  %s2583_s6 = smov 112  }
  0x49   : > { %v768_v11 = vsel %vm767_vm3, 0.0, %v765_v8  ;;  %v772_v14 = vsel %vm771_vm4, %v769_v10, 0.0  ;;  %2244 = vmatmul.mubr.msk.bf16.vlgmr.msra.gmra.mxu0 %vm799_vm2, %v786_v7  ;;  %v2154_v28 = vld [vmem:[%s3148_s30] ss:$0 sm:$0xff]  ;;  %s2584_s30 = smov 80  }
  0x4a   : > { %v785_v12 = vpack.c.bf16 %v768_v11, %v768_v11  ;;  %2256 = vmatpush3.bf16.msra.mxu0 %v2452_v9  ;;  %2259 = vmatprep.mubr.msk.bf16.mxu0 %vm2577_vm1, %v2576_v2  ;;  %v898_v15 = vpack.c.bf16 %v772_v14, %v772_v14 }
  0x4b   : > { %2257 = vmatprep.subr.bf16.mxu0 %v2576_v2 }
  0x4c   : > { %2252 = vmatmul.mubr.msk.bf16.vlgmr.msra.gmra.mxu1 %vm799_vm2, %v785_v12 }
  0x4d   : > { %2267 = vmatprep.mubr.msk.bf16.mxu1 %vm2577_vm1, %v2576_v2  ;;  %2264 = vmatpush3.bf16.msra.mxu1 %v2454_v16  ;;  %v2896_v50 = vld [vmem:[%s3150_s2] sm:$0xff] }
  0x4e   : > { %2258 = vmatpush3.bf16.msra.mxu0 %v2453_v13  ;;  %2265 = vmatprep.subr.bf16.mxu1 %v2576_v2 }
  0x4f   : > { %2271 = vmatprep.subr.bf16.mxu0 %v2576_v2 }
  0x51   : > { %2260 = vmatmul.mubr.msk.bf16.vlgmr.msra.gmra.mxu0 %vm799_vm2, %v898_v15  ;;  %2266 = vmatpush3.bf16.msra.mxu1 %v2455_v17 }
  0x52   : > { %2273 = vmatprep.mubr.msk.bf16.mxu0 %vm2577_vm1, %v2576_v2  ;;  %2277 = vmatprep.subr.bf16.mxu1 %v2576_v2 }
 0x109   : > { %v837_v18 = vpop.f32.mrf.mxu0 }
 0x10b   : > { %v2245_v20 = vpop.f32.mrf.mxu0 }
 0x10c   : > { %v892_v19 = vpop.f32.mrf.mxu1 }
 0x10d   : > { %v840_v22 = vpop.f32.mrf.mxu0  ;;  %v893_v25 = vadd.f32 %v892_v19, %v837_v18 }
 0x10e   : > { %v2253_v21 = vpop.f32.mrf.mxu1 }
 0x10f   : > { %v2246_v24 = vpop.f32.mrf.mxu0 }
 0x110   : > { %v895_v23 = vpop.f32.mrf.mxu1  ;;  %v1033_v24 = vld [vmem:[%s2781_s28] sm:$0xf] }
 0x111   : > { %v948_v27 = vpop.f32.mrf.mxu0 }
 0x112   : > { %v2254_v26 = vpop.f32.mrf.mxu1  ;;  %v954_v29 = vadd.f32 %v948_v27, %v893_v25  ;;  %v1315_v25 = vsel %vm1107_vm6, %v1033_v24, 0 }
 0x113   : > { %v2261_v30 = vpop.f32.mrf.mxu0  ;;  %v1034_v26 = vld [vmem:[%s2781_s28 + $0x4] sm:$0xf] }
 0x114   : > { %v2860_v31 = vadd.f32 %v2154_v28, %v954_v29  ;;  %v1269_v27 = vsel %vm1107_vm6, %v1034_v26, 0 }
 0x115   : > { %v951_v32 = vpop.f32.mrf.mxu0 }
 0x116   : > { %v2863_v33 = vadd.f32 %v2860_v31, %v763_v6 }
 0x117   : > { %v2262_v34 = vpop.f32.mrf.mxu0 }
 0x118   : > { %v964_v35 = vpack.c.bf16 %v2863_v33, %v2863_v33 }
 0x11a   : > { %2268 = vmatmul.mubr.msk.bf16.vlgmr.msra.gmra.mxu1 %vm799_vm2, %v964_v35 }
 0x11b   : > { %2279 = vmatprep.mubr.msk.bf16.mxu1 %vm2577_vm1, %v2576_v2 }
 0x1da   : > { %v1025_v37 = vpop.f32.mrf.mxu1 }
 0x1db   : > { %v1026_v38 = vadd.f32 %v2155_v36, %v1025_v37 }
 0x1dc   : > { %v2269_v39 = vpop.f32.mrf.mxu1 }
 0x1dd   : > { %v1031_v40 = vmul.f32 0.35355338, %v1026_v38  ;;  %v2875_v41 = vpack.c.bf16 %v1026_v38, %v1026_v38 }
 0x1de   : > { %v1028_v42 = vpop.f32.mrf.mxu1 }
 0x1df   : > { %v2877_v43 = vpack.c.bf16 %v1031_v40, %v1031_v40  ;;  %1040 = vrot.lane.b32.xlu0 %v2875_v41, %s2578_s0  ;;  %s2588_s0 = smov 40  }
 0x1e0   : > { %v2270_v44 = vpop.f32.mrf.mxu1 }
 0x1e1   : > { %1153 = vrot.lane.b32.xlu1 %v2877_v43, %s2579_s19 }
 0x1e3   : > { %1155 = vrot.lane.b32.xlu0 %v2875_v41, %s2580_s18  ;;  %s3151_s18 = scalar_lea.vmem %s3087_s7, %s2753_s21 }
 0x251   : > { %v1041_v45 = vpop.permute.xlu0 %1040 }
 0x252   : > { %v1047_v46 = vsel %vm1042_vm5, %v1041_v45, 0 }
 0x253   : > { %2272 = vmatpush3.bf16.xpose.msra.mxu0 %v1047_v46  ;;  %v1154_v49 = vpop.permute.xlu1 %1153 }
 0x254   : > { %2283 = vmatprep.subr.bf16.mxu0 %v2576_v2 }
 0x255   : > { %v1156_v47 = vpop.permute.xlu0 %1155 }
 0x256   : > { %v1161_v48 = vsel %vm1042_vm5, %v1156_v47, 0 }
 0x25a   : > { %2274 = vmatmul.mubr.msk.bf16.vlgmr.msra.gmra.mxu0 %vm1042_vm5, %v2877_v43 }
 0x25b   : > { %2284 = vmatpush3.bf16.xpose.msra.mxu0 %v1161_v48  ;;  %2285 = vmatprep.mubr.msk.bf16.mxu0 %vm2577_vm1, %v2576_v2 }
 0x25c   : > { %2295 = vmatprep.subr.bf16.mxu0 %v2576_v2 }
 0x262   : > { %2286 = vmatmul.mubr.msk.bf16.vlgmr.msra.gmra.mxu0 %vm1042_vm5, %v1154_v49 }
 0x263   : > { %2297 = vmatprep.mubr.msk.bf16.mxu0 %vm2577_vm1, %v2576_v2  ;;  %2296 = vmatpush3.bf16.msra.mxu0 %v1269_v27 }
 0x264   : > { %2307 = vmatprep.subr.bf16.mxu0 %v2576_v2 }
 0x31a   : > { %v1083_v51 = vpop.f32.mrf.mxu0 }
 0x31b   : > { %v1084_v52 = vadd.f32 %v1083_v51, %v2896_v50 }
 0x31c   : > { %v2275_v53 = vpop.f32.mrf.mxu0 }
 0x31d   : > { %v1089_v54 = vsel %vm1042_vm5, %v1084_v52, -inf }
 0x31e   : > { %1090 = vmax.xlane.f32.xlu1 %v1089_v54  ;;  %v1086_v55 = vpop.f32.mrf.mxu0 }
 0x320   : > { %v2276_v56 = vpop.f32.mrf.mxu0 }
 0x322   : > { %v1197_v57 = vpop.f32.mrf.mxu0 }
 0x323   : > { %v1198_v58 = vadd.f32 %v1197_v57, %v2896_v50 }
 0x324   : > { %v2287_v59 = vpop.f32.mrf.mxu0 }
 0x325   : > { %v1203_v60 = vsel %vm1042_vm5, %v1198_v58, -inf }
 0x326   : > { %1204 = vmax.xlane.f32.xlu0 %v1203_v60  ;;  %v1200_v61 = vpop.f32.mrf.mxu0 }
 0x328   : > { %v2288_v62 = vpop.f32.mrf.mxu0 }
 0x3a7   : > { %v1091_v63 = vpop.xlane.xlu1 %1090 }
 0x3a8   : > { %v1092_v0 = vsub.f32 %v1084_v52, %v1091_v63 }
 0x3aa   : > { %v1093_v1 = vmul.f32 1.442695, %v1092_v0 }
 0x3ac   : > { %2462 = vpow2.f32 %v1093_v1 }
 0x3af   : > { %v1205_v3 = vpop.xlane.xlu0 %1204 }
 0x3b0   : > { %v1206_v4 = vsub.f32 %v1198_v58, %v1205_v3 }
 0x3b2   : > { %v1207_v5 = vmul.f32 1.442695, %v1206_v4 }
 0x3b4   : > { %2464 = vpow2.f32 %v1207_v5 }
 0x3b9   : > { %v2463_v6 = vpop.eup %2462 }
 0x3ba   : > { %v1095_v7 = vsel %vm1042_vm5, %v2463_v6, 0.0 }
 0x3bb   : > { %1096 = vadd.xlane.f32.xlu0 %v1095_v7 }
 0x3c1   : > { %v2465_v8 = vpop.eup %2464 }
 0x3c2   : > { %v1209_v9 = vsel %vm1042_vm5, %v2465_v8, 0.0 }
 0x3c3   : > { %1210 = vadd.xlane.f32.xlu1 %v1209_v9 }
 0x3d1   : > { %1102 = vrot.lane.b32.xlu0 %v2875_v41, %s2581_s1 }
 0x3d4   : > { %1216 = vrot.lane.b32.xlu1 %v2875_v41, %s2582_s4  ;;  %s3153_s4 = scalar_lea.vmem %s3089_s9, %s2753_s21 }
 0x3d5   : > { %1357 = vrot.lane.b32.xlu0 %v2877_v43, %s2583_s6 }
 0x3d8   : > { %1359 = vrot.lane.b32.xlu1 %v2875_v41, %s2584_s30 }
 0x444   : > { %v1097_v10 = vpop.xlane.xlu0 %1096 }
 0x445   : > { %v1098_v11 = vmax.f32 %v1097_v10, 1e-30 }
 0x447   : > { %2466 = vrcp.f32 %v1098_v11 }
 0x448   : > { %v1103_v12 = vpop.permute.xlu0 %1102 }
 0x449   : > { %v1109_v13 = vsel %vm1107_vm6, %v1103_v12, 0  ;;  %v1035_v12 = vld [vmem:[%s2781_s28 + $0x8] sm:$0xf] }
 0x44a   : > { %2278 = vmatpush3.bf16.msra.mxu1 %v1109_v13  ;;  %v1473_v13 = vsel %vm1107_vm6, %v1035_v12, 0 }
 0x44b   : > { %2289 = vmatprep.subr.bf16.mxu1 %v2576_v2 }
 0x44c   : > { %v1211_v14 = vpop.xlane.xlu1 %1210  ;;  %v1358_v44 = vpop.permute.xlu0 %1357 }
 0x44d   : > { %v1212_v15 = vmax.f32 %v1211_v14, 1e-30 }
 0x44f   : > { %2468 = vrcp.f32 %v1212_v15 }
 0x450   : > { %v1217_v18 = vpop.permute.xlu1 %1216 }
 0x451   : > { %v1222_v20 = vsel %vm1107_vm6, %v1217_v18, 0 }
 0x454   : > { %v2467_v16 = vpop.eup %2466  ;;  %v1360_v35 = vpop.permute.xlu1 %1359 }
 0x455   : > { %v1100_v17 = vmul.f32 %v2467_v16, %v2463_v6  ;;  %v1365_v39 = vsel %vm1042_vm5, %v1360_v35, 0 }
 0x457   : > { %v1101_v19 = vpack.c.bf16 %v1100_v17, %v1100_v17 }
 0x459   : > { %2280 = vmatmul.mubr.msk.bf16.vlgmr.msra.gmra.mxu1 %vm1042_vm5, %v1101_v19 }
 0x45a   : > { %2290 = vmatpush3.bf16.msra.mxu1 %v1222_v20  ;;  %2291 = vmatprep.mubr.msk.bf16.mxu1 %vm2577_vm1, %v2576_v2 }
 0x45b   : > { %2301 = vmatprep.subr.bf16.mxu1 %v2576_v2 }
 0x45c   : > { %v2469_v21 = vpop.eup %2468 }
 0x45d   : > { %v1214_v22 = vmul.f32 %v2469_v21, %v2465_v8 }
 0x45f   : > { %v1215_v23 = vpack.c.bf16 %v1214_v22, %v1214_v22 }
 0x461   : > { %2292 = vmatmul.mubr.msk.bf16.vlgmr.msra.gmra.mxu1 %vm1042_vm5, %v1215_v23 }
 0x462   : > { %2303 = vmatprep.mubr.msk.bf16.mxu1 %vm2577_vm1, %v2576_v2  ;;  %2302 = vmatpush3.bf16.msra.mxu1 %v1315_v25 }
 0x463   : > { %2313 = vmatprep.subr.bf16.mxu1 %v2576_v2 }
 0x519   : > { %v1145_v28 = vpop.f32.mrf.mxu1 }
 0x51a   : > { %v1151_v29 = vpack.c.bf16 %v1145_v28, %v1145_v28 }
 0x51b   : > { %v2281_v30 = vpop.f32.mrf.mxu1 }
 0x51c   : > { %2304 = vmatmul.mubr.msk.bf16.vlgmr.msra.gmra.mxu1 %vm1042_vm5, %v1151_v29 }
 0x51d   : > { %v1148_v32 = vpop.f32.mrf.mxu1  ;;  %2315 = vmatprep.mubr.msk.bf16.mxu1 %vm2577_vm1, %v2576_v2 }
 0x51f   : > { %v2282_v34 = vpop.f32.mrf.mxu1 }
 0x521   : > { %v1258_v36 = vpop.f32.mrf.mxu1 }
 0x522   : > { %v1264_v37 = vpack.c.bf16 %v1258_v36, %v1258_v36  ;;  %v1036_v36 = vld [vmem:[%s2781_s28 + $0xc] sm:$0xf]  ;;  %s3155_s28 = sld [smem:[#allocation9_spill]] }
 0x523   : > { %v2293_v38 = vpop.f32.mrf.mxu1 }
 0x524   : > { %2298 = vmatmul.mubr.msk.bf16.vlgmr.msra.gmra.mxu0 %vm1042_vm5, %v1264_v37  ;;  %v1632_v37 = vsel %vm1107_vm6, %v1036_v36, 0 }
 0x525   : > { %2308 = vmatpush3.bf16.xpose.msra.mxu0 %v1365_v39  ;;  %v1261_v40 = vpop.f32.mrf.mxu1  ;;  %2309 = vmatprep.mubr.msk.bf16.mxu0 %vm2577_vm1, %v2576_v2 }
 0x526   : > { %2319 = vmatprep.subr.bf16.mxu0 %v2576_v2 }
 0x527   : > { %v2294_v42 = vpop.f32.mrf.mxu1 }
 0x528   : > { %p2186_p1 = scmp.ne.s32.totalorder %s3155_s28, 1 }
 0x52c   : > { %2310 = vmatmul.mubr.msk.bf16.vlgmr.msra.gmra.mxu0 %vm1042_vm5, %v1358_v44 }
 0x52d   : > { %2321 = vmatprep.mubr.msk.bf16.mxu0 %vm2577_vm1, %v2576_v2  ;;  %2320 = vmatpush3.bf16.msra.mxu0 %v1473_v13 }
 0x52e   : > { %2331 = vmatprep.subr.bf16.mxu0 %v2576_v2 }
 0x5dc   : > { %v1351_v45 = vpop.f32.mrf.mxu1 }
 0x5de   : > { %v2305_v46 = vpop.f32.mrf.mxu1 }
 0x5e0   : > { %v1354_v47 = vpop.f32.mrf.mxu1 }
 0x5e2   : > { %v2306_v48 = vpop.f32.mrf.mxu1 }
 0x5e4   : > { %v1305_v49 = vpop.f32.mrf.mxu0 }
 0x5e5   : > { %v2935_v51 = vadd.f32 %v1351_v45, %v1305_v49 }
 0x5e6   : > { %v2299_v52 = vpop.f32.mrf.mxu0 }
 0x5e8   : > { %v1308_v53 = vpop.f32.mrf.mxu0 }
 0x5e9   : > { %v2171_v53 = vld [vmem:[%s3151_s18] ss:$0 sm:$0xff] }
 0x5ea   : > { %v2300_v54 = vpop.f32.mrf.mxu0 }
 0x5ec   : > { %v1401_v55 = vpop.f32.mrf.mxu0 }
 0x5ed   : > { %v1402_v56 = vadd.f32 %v1401_v55, %v2896_v50 }
 0x5ee   : > { %v2311_v57 = vpop.f32.mrf.mxu0 }
 0x5ef   : > { %v1407_v58 = vsel %vm1042_vm5, %v1402_v56, -inf }
 0x5f0   : > { %1408 = vmax.xlane.f32.xlu1 %v1407_v58  ;;  %v1404_v59 = vpop.f32.mrf.mxu0 }
 0x5f2   : > { %v2312_v60 = vpop.f32.mrf.mxu0 }
 0x601   : > { %1518 = vrot.lane.b32.xlu1 %v2875_v41, %s2585_s3 }
 0x605   : > { %1516 = vrot.lane.b32.xlu1 %v2877_v43, %s2586_s16 }
 0x679   : > { %v1409_v61 = vpop.xlane.xlu1 %1408 }
 0x67a   : > { %v1410_v62 = vsub.f32 %v1402_v56, %v1409_v61 }
 0x67c   : > { %v1411_v63 = vmul.f32 1.442695, %v1410_v62 }
 0x67d   : > { %v1519_v8 = vpop.permute.xlu1 %1518 }
 0x67e   : > { %2470 = vpow2.f32 %v1411_v63  ;;  %v1524_v10 = vsel %vm1042_vm5, %v1519_v8, 0 }
 0x681   : > { %v1517_v11 = vpop.permute.xlu1 %1516 }
 0x68b   : > { %v2471_v0 = vpop.eup %2470 }
 0x68c   : > { %v1413_v1 = vsel %vm1042_vm5, %v2471_v0, 0.0 }
 0x68d   : > { %1414 = vadd.xlane.f32.xlu0 %v1413_v1 }
 0x6a3   : > { %1420 = vrot.lane.b32.xlu0 %v2875_v41, %s2587_s25 }
 0x716   : > { %v1415_v3 = vpop.xlane.xlu0 %1414 }
 0x717   : > { %v1416_v4 = vmax.f32 %v1415_v3, 1e-30  ;;  %v2456_v3 = vld [vmem:[%s2798_s20 + $0x8] sm:$0xff]  }
 0x719   : > { %2472 = vrcp.f32 %v1416_v4  ;;  %v2457_v4 = vld [vmem:[%s2798_s20] sm:$0xff]  }
 0x71a   : > { %v1421_v5 = vpop.permute.xlu0 %1420 }
 0x71b   : > { %v1426_v6 = vsel %vm1107_vm6, %v1421_v5, 0  ;;  %v2459_v5 = vld [vmem:[%s2808_s22 + $0x10] sm:$0xff]  }
 0x71c   : > { %2314 = vmatpush3.bf16.msra.mxu1 %v1426_v6 }
 0x71d   : > { %2325 = vmatprep.subr.bf16.mxu1 %v2576_v2 }
 0x726   : > { %v2473_v43 = vpop.eup %2472 }
 0x727   : > { %v1418_v7 = vmul.f32 %v2473_v43, %v2471_v0 }
 0x729   : > { %v1419_v9 = vpack.c.bf16 %v1418_v7, %v1418_v7 }
 0x72b   : > { %2316 = vmatmul.mubr.msk.bf16.vlgmr.msra.gmra.mxu1 %vm1042_vm5, %v1419_v9  ;;  %v2172_v9 = vld [vmem:[%s3152_s23] ss:$0 sm:$0xff] }
 0x72c   : > { %2326 = vmatpush3.bf16.xpose.msra.mxu1 %v1524_v10  ;;  %2327 = vmatprep.mubr.msk.bf16.mxu1 %vm2577_vm1, %v2576_v2 }
 0x72d   : > { %2337 = vmatprep.subr.bf16.mxu1 %v2576_v2 }
 0x733   : > { %2328 = vmatmul.mubr.msk.bf16.vlgmr.msra.gmra.mxu1 %vm1042_vm5, %v1517_v11  ;;  %v2173_v11 = vld [vmem:[%s3153_s4] ss:$0 sm:$0xff] }
 0x734   : > { %2339 = vmatprep.mubr.msk.bf16.mxu1 %vm2577_vm1, %v2576_v2  ;;  %2338 = vmatpush3.bf16.msra.mxu1 %v1632_v37 }
 0x735   : > { %2351 = vmatprep.subr.bf16.mxu1 %v2576_v2 }
 0x7eb   : > { %v1462_v14 = vpop.f32.mrf.mxu1 }
 0x7ec   : > { %v1468_v15 = vpack.c.bf16 %v1462_v14, %v1462_v14 }
 0x7ed   : > { %v2317_v16 = vpop.f32.mrf.mxu1 }
 0x7ee   : > { %2322 = vmatmul.mubr.msk.bf16.vlgmr.msra.gmra.mxu0 %vm1042_vm5, %v1468_v15  ;;  %v2460_v15 = vld [vmem:[%s2808_s22 + $0x8] sm:$0xff]   ;;  %v2461_v16 = vld [vmem:[%s2808_s22] sm:$0xff]  }
 0x7ef   : > { %v1465_v17 = vpop.f32.mrf.mxu1  ;;  %2333 = vmatprep.mubr.msk.bf16.mxu0 %vm2577_vm1, %v2576_v2 }
 0x7f0   : > { %v2174_v17 = vld [vmem:[%s740_s29] ss:$0 sm:$0xff] }
 0x7f1   : > { %v2318_v18 = vpop.f32.mrf.mxu1 }
 0x7f3   : > { %v1560_v19 = vpop.f32.mrf.mxu1 }
 0x7f4   : > { %v1561_v20 = vadd.f32 %v1560_v19, %v2896_v50 }
 0x7f5   : > { %v2329_v21 = vpop.f32.mrf.mxu1 }
 0x7f6   : > { %v1566_v22 = vsel %vm1042_vm5, %v1561_v20, -inf }
 0x7f7   : > { %1567 = vmax.xlane.f32.xlu0 %v1566_v22  ;;  %v1563_v23 = vpop.f32.mrf.mxu1 }
 0x7f9   : > { %v2330_v24 = vpop.f32.mrf.mxu1 }
 0x80d   : > { %1579 = vrot.lane.b32.xlu0 %v2875_v41, %s2588_s0 }
 0x880   : > { %v1568_v25 = vpop.xlane.xlu0 %1567 }
 0x881   : > { %v1569_v26 = vsub.f32 %v1561_v20, %v1568_v25 }
 0x883   : > { %v1570_v27 = vmul.f32 1.442695, %v1569_v26 }
 0x884   : > { %v1580_v28 = vpop.permute.xlu0 %1579 }
 0x885   : > { %2474 = vpow2.f32 %v1570_v27  ;;  %v1585_v29 = vsel %vm1107_vm6, %v1580_v28, 0 }
 0x886   : > { %2332 = vmatpush3.bf16.msra.mxu0 %v1585_v29 }
 0x887   : > { %2343 = vmatprep.subr.bf16.mxu0 %v2576_v2 }
 0x892   : > { %v2475_v50 = vpop.eup %2474 }
 0x893   : > { %v1572_v30 = vsel %vm1042_vm5, %v2475_v50, 0.0 }
 0x894   : > { %1573 = vadd.xlane.f32.xlu1 %v1572_v30 }
 0x8ae   : > { %v1509_v32 = vpop.f32.mrf.mxu0 }
 0x8af   : > { %v1515_v34 = vadd.f32 %v1509_v32, %v2935_v51 }
 0x8b0   : > { %v2323_v35 = vpop.f32.mrf.mxu0 }
 0x8b2   : > { %v1512_v41 = vpop.f32.mrf.mxu0 }
 0x8b4   : > { %v2324_v38 = vpop.f32.mrf.mxu0 }
 0x91d   : > { %v1574_v39 = vpop.xlane.xlu1 %1573 }
 0x91e   : > { %v1575_v40 = vmax.f32 %v1574_v39, 1e-30 }
 0x920   : > { %2476 = vrcp.f32 %v1575_v40 }
 0x92d   : > { %v2477_v42 = vpop.eup %2476 }
 0x92e   : > { %v1577_v44 = vmul.f32 %v2477_v42, %v2475_v50  ;;  %v2184_v42 = vld [vmem:[%s751_s17] ss:$0 sm:$0xff] }
 0x930   : > { %v1578_v45 = vpack.c.bf16 %v1577_v44, %v1577_v44 }
 0x932   : > { %2334 = vmatmul.mubr.msk.bf16.vlgmr.msra.gmra.mxu0 %vm1042_vm5, %v1578_v45  ;;  %v2185_v45 = vld [vmem:[%s754_s10] ss:$0 sm:$0xff] }
 0x933   : > { %2347 = vmatprep.mubr.msk.bf16.mxu0 %vm2577_vm1, %v2576_v2  ;;  %2344 = vmatpush3.bf16.msra.mxu0 %v2456_v3 }
 0x934   : > { %2345 = vmatprep.subr.bf16.mxu0 %v2576_v2 }
 0x937   : > { %2346 = vmatpush3.bf16.msra.mxu0 %v2457_v4 }
 0x9f2   : > { %v1621_v46 = vpop.f32.mrf.mxu0 }
 0x9f3   : > { %v1627_v47 = vpack.c.bf16 %v1621_v46, %v1621_v46 }
 0x9f4   : > { %v2335_v48 = vpop.f32.mrf.mxu0 }
 0x9f5   : > { %2340 = vmatmul.mubr.msk.bf16.vlgmr.msra.gmra.mxu1 %vm1042_vm5, %v1627_v47 }
 0x9f6   : > { %v1624_v49 = vpop.f32.mrf.mxu0  ;;  %2359 = vmatprep.mubr.msk.bf16.mxu1 %vm2577_vm1, %v2576_v2 }
 0x9f8   : > { %v2336_v51 = vpop.f32.mrf.mxu0 }
 0xab5   : > { %v1668_v52 = vpop.f32.mrf.mxu1 }
 0xab6   : > { %v1674_v54 = vadd.f32 %v1668_v52, %v1515_v34 }
 0xab7   : > { %v2341_v55 = vpop.f32.mrf.mxu1 }
 0xab8   : > { %v1682_v56 = vadd.f32 %v2171_v53, %v1674_v54 }
 0xab9   : > { %v1671_v57 = vpop.f32.mrf.mxu1 }
 0xaba   : > { %v1683_v58 = vadd.f32 %v1682_v56, %v2863_v33  ;;  %v2458_v33 = vld [vmem:[%s2808_s22 + $0x18] sm:$0xff]  }
 0xabb   : > { %v2342_v59 = vpop.f32.mrf.mxu1  ;;  %2352 = vmatpush3.bf16.msra.mxu1 %v2458_v33 }
 0xabc   : > { %v1684_v60 = vsel %vm799_vm2, %v1683_v58, 0.0  ;;  %2353 = vmatprep.subr.bf16.mxu1 %v2576_v2 }
 0xabd   : > { %1685 = vadd.xlane.f32.xlu1 %v1684_v60 }
 0xabf   : > { %2354 = vmatpush3.bf16.msra.mxu1 %v2459_v5 }
 0xac0   : > { %2355 = vmatprep.subr.bf16.mxu1 %v2576_v2 }
 0xac3   : > { %2356 = vmatpush3.bf16.msra.mxu1 %v2460_v15 }
 0xac4   : > { %2357 = vmatprep.subr.bf16.mxu1 %v2576_v2  ;;  %v2178_v2 = vld [vmem:[%s748_s24] ss:$0 sm:$0xff] }
 0xac7   : > { %2358 = vmatpush3.bf16.msra.mxu1 %v2461_v16 }
 0xb46   : > { %v1686_v61 = vpop.xlane.xlu1 %1685 }
 0xb47   : > { %v1688_v62 = vmul.f32 0.03125, %v1686_v61 }
 0xb49   : > { %v1689_v63 = vsub.f32 %v1683_v58, %v1688_v62 }
 0xb4b   : > { %v1690_v0 = vmul.f32 %v1689_v63, %v1689_v63 }
 0xb4d   : > { %v1691_v1 = vsel %vm799_vm2, %v1690_v0, 0.0 }
 0xb4e   : > { %1692 = vadd.xlane.f32.xlu1 %v1691_v1 }
 0xbd7   : > { %v1693_v6 = vpop.xlane.xlu1 %1692 }
 0xbd8   : > { %v1694_v43 = vmul.f32 0.03125, %v1693_v6 }
 0xbda   : > { %v1695_v7 = vadd.f32 1e-05, %v1694_v43 }
 0xbdc   : > { %2478 = vrsqrt.f32 %v1695_v7 }
 0xbe9   : > { %v2479_v8 = vpop.eup %2478 }
 0xbea   : > { %v1697_v10 = vmul.f32 %v2479_v8, %v1689_v63 }
 0xbec   : > { %v1705_v12 = vmul.f32 %v2172_v9, %v1697_v10 }
 0xbee   : > { %v1713_v13 = vadd.f32 %v2173_v11, %v1705_v12 }
 0xbf0   : > { %v1714_v14 = vpack.c.bf16 %v1713_v13, %v1713_v13 }
 0xbf2   : > { %2348 = vmatmul.mubr.msk.bf16.vlgmr.msra.gmra.mxu0 %vm799_vm2, %v1714_v14 }
 0xcb2   : > { %v1775_v18 = vpop.f32.mrf.mxu0 }
 0xcb3   : > { %v1776_v19 = vadd.f32 %v2174_v17, %v1775_v18 }
 0xcb4   : > { %v2349_v20 = vpop.f32.mrf.mxu0 }
 0xcb5   : > { %v1781_v21 = vmax.f32 %v1776_v19, 0.0 }
 0xcb6   : > { %v1778_v22 = vpop.f32.mrf.mxu0 }
 0xcb7   : > { %v1782_v23 = vpack.c.bf16 %v1781_v21, %v1781_v21 }
 0xcb8   : > { %v2350_v24 = vpop.f32.mrf.mxu0 }
 0xcb9   : > { %2360 = vmatmul.mubr.msk.bf16.vlgmr.msra.gmra.mxu1 %vm1822_vm7, %v1782_v23 }
 0xd79   : > { %v1860_v25 = vpop.f32.mrf.mxu1 }
 0xd7a   : > { %v1861_v26 = vadd.f32 %v2178_v2, %v1860_v25 }
 0xd7b   : > { %v2361_v27 = vpop.f32.mrf.mxu1 }
 0xd7c   : > { %v1866_v28 = vadd.f32 %v1861_v26, %v1713_v13 }
 0xd7d   : > { %v1863_v29 = vpop.f32.mrf.mxu1 }
 0xd7e   : > { %v1867_v50 = vsel %vm799_vm2, %v1866_v28, 0.0 }
 0xd7f   : > { %1868 = vadd.xlane.f32.xlu1 %v1867_v50  ;;  %v2362_v30 = vpop.f32.mrf.mxu1 }
 0xe08   : > { %v1869_v32 = vpop.xlane.xlu1 %1868 }
 0xe09   : > { %v1870_v34 = vmul.f32 0.03125, %v1869_v32 }
 0xe0b   : > { %v1871_v35 = vsub.f32 %v1866_v28, %v1870_v34 }
 0xe0d   : > { %v1872_v41 = vmul.f32 %v1871_v35, %v1871_v35 }
 0xe0f   : > { %v1873_v36 = vsel %vm799_vm2, %v1872_v41, 0.0 }
 0xe10   : > { %1874 = vadd.xlane.f32.xlu1 %v1873_v36 }
 0xe99   : > { %v1875_v37 = vpop.xlane.xlu1 %1874 }
 0xe9a   : > { %v1876_v38 = vmul.f32 0.03125, %v1875_v37 }
 0xe9c   : > { %v1877_v39 = vadd.f32 1e-05, %v1876_v38 }
 0xe9e   : > { %2480 = vrsqrt.f32 %v1877_v39 }
 0xeab   : > { %v2481_v40 = vpop.eup %2480 }
 0xeac   : > { %v1879_v44 = vmul.f32 %v2481_v40, %v1871_v35 }
 0xeae   : > { %v1887_v46 = vmul.f32 %v2184_v42, %v1879_v44  ;;  %1900 = sbr.rel (%p2186_p1) target bundleno = 3766 (0xeb6), region = 92 }
 0xeb0   : > { %v1895_v47 = vadd.f32 %v2185_v45, %v1887_v46 }
 0xeb2   : > { %1896 = vst.msk [vmem:[#allocation2] sm:$0xff] %vm799_vm2, %v1895_v47 }
 0xeb3   : > { %v1901_v48 = vadd.f32 %v1895_v47, %v2860_v31 }
 0xeb5   : > { %1902 = vst.msk [vmem:[%s698_s15] sm:$0xff] %vm799_vm2, %v1901_v48 }
 0xeb6 PF: > { %s3156_s17 = sld [smem:[#allocation10_spill]]  ;;  %s1917_s1 = sshll.u32 %s698_s15, 4  ;;  %s1918_s1 = int_to_ptr.vmem [resolvable:$true] %s1917_s1 }
 0xeb7   : > { %s3157_s19 = sld [smem:[#allocation7_spill]]  ;;  %s2482_s30 = scalar_lea.vmem %s1918_s1, 128 }
 0xeb8   : > { %s3159_s27 = sld [smem:[#allocation28_spill]]  ;;  %p2483_p2 = scmp.ne.s32.totalorder %s1918_s1, %s2482_s30 }
 0xeb9   : > { %s2589_s3 = smov [#allocation3]  }
 0xeba   : > { %p2484_p4 = pnand %p2483_p2, %p2724_p3  ;;  %s2486_s16 = sshll.u32 %s2589_s3, 4  ;;  %s2487_s16 = int_to_ptr.vmem [resolvable:$false] %s2486_s16 }
 0xebb   : > { %s2488_s29 = scalar_lea.vmem %s2487_s16, 256  ;;  %p2489_p6 = scmp.lt.s32.totalorder %s1918_s1, %s2487_s16 }
 0xebc   : > { %s2188_s21 = sshll.u32 %s3156_s17, 7  ;;  %p2485_p5 = pneg %p2484_p4 }
 0xebd   : > { %s3161_s4 = sand.u32 1, %s3157_s19   ;;  %p2490_p7 = scmp.lt.s32.totalorder %s2488_s29, %s2482_s30 }
 0xebe   : > { %s3160_s2 = smov %s3159_s27  ;;  %s1915_s23 = scalar_lea.hbm %s3159_s27, %s2188_s21 }
 0xebf   : > { %s1904_s6 = scalar_lea.sflag [#allocation4], %s3161_s4  ;;  %p2491_p8 = por %p2490_p7, %p2489_p6 }
 0xec1   : > { %p2492_p10 = pnand %p2491_p8, %p2485_p5 }
 0xec3   : > { %2495 = shalt.err (!%p2492_p10)
}
 0xec4   : > { %s2496_s22 = scalar_lea.hbm %s1915_s23, 128  ;;  %s2500_s24 = scalar_lea.hbm %s3160_s2, 256 }
 0xec5   : > { %p2497_p11 = scmp.ne.s32.totalorder %s1915_s23, %s2496_s22  ;;  %p2501_p0 = scmp.lt.s32.totalorder %s1915_s23, %s3160_s2 }
 0xec6   : > { %p2502_p1 = scmp.lt.s32.totalorder %s2500_s24, %s2496_s22 }
 0xec7   : > { %p2498_p12 = pnand %p2497_p11, %p2724_p3 }
 0xec8   : > { %p2503_p2 = por %p2502_p1, %p2501_p0 }
 0xec9   : > { %p2499_p13 = pneg %p2498_p12 }
 0xecb   : > { %p2504_p4 = pnand %p2503_p2, %p2499_p13 }
 0xecd   : > { %2507 = shalt.err (!%p2504_p4)
}
 0xece   : > { %2364 = dma.vmem_to_hbm [thread:$0]  (%p2724_p3), %s1918_s1, 128, %s1915_s23, %s1904_s6  }
 0xecf PF: > { %s3162_s28 = sld [smem:[#allocation13_spill]] }
 0xed0   : > { %s3163_s17 = sld [smem:[#allocation6_spill]] }
 0xed5   : > { %p2370_p5 = scmp.ge.s32.totalorder %s3162_s28, 2 }
 0xed6   : > { %s1929_s21 = sand.u32 1, %s3163_s17  }
 0xed7   : > { %p2367_p6 = pnand %p2370_p5, %p2734_p9  ;;  %s1930_s10 = scalar_lea.sflag [#allocation4], %s1929_s21 }
 0xed9   : > { %p2368_p7 = pneg %p2367_p6 }
 0xedb   : > { %2541 = dma.done.wait (%p2368_p7), %s1930_s10, 128  }
 0xedc   : > { %2543 = vsyncadd (%p2368_p7), %s1930_s10, 4294967168  ;;  %s29_s28 = sadd.s32 1, %s3162_s28   ;;  %s3165_s21 = sld [smem:[#allocation7_spill]] }
 0xedd   : > { %p26_p8 = scmp.ge.s32.totalorder %s29_s28, 6   ;;  %s3166_s22 = sld [smem:[#allocation8_spill]] }
 0xede   : > { %s3167_s23 = sld [smem:[#allocation18_spill]] }
 0xedf   : > { %s3168_s24 = sld [smem:[#allocation11_spill]]  ;;  %28 = sbr.rel (!%p26_p8) target bundleno = 15 (0xf), region = 169 }
 0xee0   : > { %s3169_s25 = sld [smem:[#allocation12_spill]] }
 0xee1   : > { %s3170_s26 = sld [smem:[#allocation14_spill]] }
 0xee2   : > { %s3171_s27 = sld [smem:[#allocation16_spill]] }
 0xee4   :  { %1935 = vsyncpa [#allocation4], 1 }
 0xee5   :  { %1937 = vsyncpa [#allocation4 + $0x1], 1 }

</bundles_post_ra>
